<compile_context>
chip_gen: v6e
topology: v6e:2x2x1
jax: 0.10.0
libtpu: 0.0.40
codegen_flags: <defaults>
</compile_context>

<pallas_src>
import functools

import jax
import jax.numpy as jnp
from jax.experimental import pallas as pl
from jax.experimental.pallas import tpu as pltpu


# ----------------------------------------------------------------------------
# 1) Hoisted input projection: GX = sum_p x_p @ W_ih[p] + b_ih   (gates r|z|n)
# ----------------------------------------------------------------------------
def _make_proj_kernel(n_parts):
    def kernel(*refs):
        x_refs = refs[:n_parts]          # each (block_rows, Hin)
        w_ref = refs[n_parts]            # (n_parts, Hin, 3H), fused gates r|z|n
        b_ref = refs[n_parts + 1]        # (1, 3H)
        o_ref = refs[n_parts + 2]        # (block_rows, 3H)
        acc = jnp.dot(x_refs[0][...], w_ref[0], preferred_element_type=jnp.float32)
        for p in range(1, n_parts):
            acc = acc + jnp.dot(x_refs[p][...], w_ref[p],
                                preferred_element_type=jnp.float32)
        o_ref[...] = (acc + b_ref[...]).astype(o_ref.dtype)
    return kernel


def input_projection(x_parts, wih, bih, *, row_cap=256):
    """x_parts: list of [rows, Hin] f32; wih: [n_parts, Hin, 3H]; bih: [1, 3H].
    Returns GX [rows, 3H] = sum_p x_p @ wih[p] + bih (fully parallel matmul)."""
    rows, hin = x_parts[0].shape
    n_parts, _, g3 = wih.shape
    block_rows = rows if rows <= row_cap else row_cap   # cap is a multiple of 8
    return pl.pallas_call(
        _make_proj_kernel(n_parts),
        out_shape=jax.ShapeDtypeStruct((rows, g3), jnp.float32),
        grid=(pl.cdiv(rows, block_rows),),
        in_specs=[pl.BlockSpec((block_rows, hin), lambda i: (i, 0))
                  for _ in range(n_parts)]
                 + [pl.BlockSpec((n_parts, hin, g3), lambda i: (0, 0, 0)),
                    pl.BlockSpec((1, g3), lambda i: (0, 0))],
        out_specs=pl.BlockSpec((block_rows, g3), lambda i: (i, 0)),
        compiler_params=pltpu.CompilerParams(
            dimension_semantics=("parallel",),
            vmem_limit_bytes=64 * 1024 * 1024),
        cost_estimate=pl.CostEstimate(
            flops=2 * rows * hin * g3 * n_parts,
            transcendentals=0,
            bytes_accessed=4 * (rows * hin * n_parts + n_parts * hin * g3
                                + g3 + rows * g3)),
    )(*x_parts, wih, bih)


# ----------------------------------------------------------------------------
# 2) GRU recurrence (one direction): grid over time blocks, hidden in VMEM,
#    W_hh resident in a single-buffered VMEM scratch (manual DMA once).
# ----------------------------------------------------------------------------
def _gru_scan_kernel(gx_ref, whh_hbm, bhh_ref, y_ref, h_ref, whh_vmem, dma_sem,
                     *, t_block, reverse, hidden):
    """Processes t_block timesteps per grid step.  Gate order (r, z, n) along the
    fused 3H axis, matching torch.nn.GRU."""
    @pl.when(pl.program_id(0) == 0)
    def _():
        h_ref[...] = jnp.zeros_like(h_ref)          # h0 = 0 (PyTorch default)
        cp = pltpu.make_async_copy(whh_hbm, whh_vmem, dma_sem)
        cp.start()
        cp.wait()                                   # W_hh resident from now on

    whh = whh_vmem[...]                             # (H, 3H)
    bhh = bhh_ref[...]                              # (1, 3H)
    H = hidden
    h = h_ref[...]                                  # (B, H) carried state
    for s in range(t_block):                        # statically unrolled time block
        idx = (t_block - 1 - s) if reverse else s
        gx = gx_ref[idx]                            # (B, 3H): precomputed x@W_ih + b_ih
        gh = jnp.dot(h, whh, preferred_element_type=jnp.float32) + bhh
        r = jax.nn.sigmoid(gx[:, :H] + gh[:, :H])
        z = jax.nn.sigmoid(gx[:, H:2 * H] + gh[:, H:2 * H])
        n = jnp.tanh(gx[:, 2 * H:] + r * gh[:, 2 * H:])   # r gates (W_hh h + b_hn)
        h = (1.0 - z) * n + z * h
        y_ref[idx] = h.astype(y_ref.dtype)
    h_ref[...] = h


def _pick_time_block(seq_len, cap=32):
    """Largest divisor of seq_len <= cap.  Blocking timesteps amortizes the
    ~0.35us per-grid-step overhead; using a divisor keeps the reversed direction
    exact (no ragged garbage steps feeding the carried hidden state)."""
    t = min(seq_len, cap)
    while seq_len % t:
        t -= 1
    return t


def gru_recurrence(gx, whh, bhh, *, reverse, t_block):
    """gx: [S, B, 3H] precomputed input projection; whh: [H, 3H]; bhh: [1, 3H].
    Returns per-step hiddens [S, B, H]."""
    S, B, G3 = gx.shape
    H = whh.shape[0]
    nb = S // t_block
    assert nb * t_block == S

    def tmap(t):                                    # reverse handled by the index_map
        return ((nb - 1 - t) if reverse else t, 0, 0)

    kernel = functools.partial(_gru_scan_kernel, t_block=t_block,
                               reverse=reverse, hidden=H)
    return pl.pallas_call(
        kernel,
        out_shape=jax.ShapeDtypeStruct((S, B, H), jnp.float32),
        grid=(nb,),
        in_specs=[
            pl.BlockSpec((t_block, B, G3), tmap),         # pipelined GX time blocks
            pl.BlockSpec(memory_space=pl.ANY),            # W_hh stays in HBM; copied once
            pl.BlockSpec((1, G3), lambda t: (0, 0)),      # b_hh (tiny)
        ],
        out_specs=pl.BlockSpec((t_block, B, H), tmap),
        scratch_shapes=[
            pltpu.VMEM((B, H), jnp.float32),              # carried hidden state
            pltpu.VMEM((H, G3), jnp.float32),             # single-buffered resident W_hh
            pltpu.SemaphoreType.DMA(()),
        ],
        compiler_params=pltpu.CompilerParams(
            dimension_semantics=("arbitrary",),           # time is sequential
            vmem_limit_bytes=64 * 1024 * 1024),
    )(gx, whh, bhh)


# ----------------------------------------------------------------------------
# 3) Output head: nn.Linear(2H, 1) as a lane-dense VPU multiply + lane reduce.
# ----------------------------------------------------------------------------
def _nsp_head_kernel(x_ref, w_ref, b_ref, o_ref):
    acc = jnp.sum(x_ref[...] * w_ref[...], axis=-1, keepdims=True)   # (block_b, 1)
    o_ref[...] = (acc + b_ref[0, 0]).astype(o_ref.dtype)             # SMEM scalar bias


def _pick_block_b(batch, features, target_bytes=2 << 20):
    if batch <= 8:
        return batch                                  # == full array dim (allowed)
    rows = max(8, target_bytes // (features * 4))
    block = min(batch, int(rows))
    return max(8, (block // 8) * 8)                   # fixed multiple of 8; cdiv grid masks tail


def nsp_head(hidden, weight, bias):
    """hidden: [B, F] f32, weight: [1, F] (torch nn.Linear layout), bias: [1]."""
    B, F = hidden.shape
    block_b = _pick_block_b(B, F)
    bias_smem = bias.reshape(1, 1)
    return pl.pallas_call(
        _nsp_head_kernel,
        out_shape=jax.ShapeDtypeStruct((B, 1), hidden.dtype),
        grid=(pl.cdiv(B, block_b),),
        in_specs=[
            pl.BlockSpec((block_b, F), lambda i: (i, 0)),
            pl.BlockSpec((1, F), lambda i: (0, 0)),             # lane-dense weight
            pl.BlockSpec(memory_space=pltpu.MemorySpace.SMEM),  # (1,1) scalar bias
        ],
        out_specs=pl.BlockSpec((block_b, 1), lambda i: (i, 0)),
        compiler_params=pltpu.CompilerParams(dimension_semantics=("parallel",)),
        cost_estimate=pl.CostEstimate(
            flops=2 * B * F, transcendentals=0,
            bytes_accessed=4 * (B * F + F + B + 1)),
    )(hidden, weight, bias_smem)


# ----------------------------------------------------------------------------
# Full NSP_gru forward.
# ----------------------------------------------------------------------------
def nsp_gru_forward(embedded, gru_params, out_weight, out_bias):
    """embedded: [B, S, D] (stands in for albert(*input)[0]).
    gru_params: list over layers of {'fwd'/'bwd': (wih, whh, bih, bhh)} with
      wih: [n_parts, Hin, 3H], whh: [H, 3H], bih/bhh: [1, 3H] (gate order r|z|n)."""
    # TODO(synk): the frozen ALBERT backbone (albert(*input)[0]) is a full
    # pretrained transformer with no clean single-kernel Pallas equivalent; its
    # sequence output is taken directly as the kernel input here.
    B, S, D = embedded.shape
    H = gru_params[0]["fwd"][1].shape[0]
    t_block = _pick_time_block(S)
    # Time-major, flattened to rows for the hoisted projection matmul (free reshape).
    x_parts = [jnp.transpose(embedded, (1, 0, 2)).reshape(S * B, D)]
    y_f = y_b = None
    for layer in gru_params:
        ys = {}
        for direction, reverse in (("fwd", False), ("bwd", True)):
            wih, whh, bih, bhh = layer[direction]
            gx = input_projection(x_parts, wih, bih)            # [S*B, 3H] parallel matmul
            gx = gx.reshape(S, B, 3 * H)
            ys[direction] = gru_recurrence(gx, whh, bhh,
                                           reverse=reverse, t_block=t_block)
        y_f, y_b = ys["fwd"], ys["bwd"]
        # Next layer consumes y_f / y_b as two separate projection inputs:
        # no [S, B, 2H] concat HBM round trip.
        x_parts = [y_f.reshape(S * B, H), y_b.reshape(S * B, H)]
        # TODO(synk): torch.nn.GRU inter-layer dropout (p=0.3) is identity in
        # eval mode and is omitted here.
    # hidden[-2] = last-layer forward final state, hidden[-1] = backward final state
    hidden = jnp.concatenate([y_f[-1], y_b[0]], axis=-1)        # [B, 2H], tiny
    # TODO(synk): self.dropout (p=0.3) is identity in eval mode and is omitted.
    return nsp_head(hidden, out_weight, out_bias)


# ----------------------------------------------------------------------------
# Pure-JAX reference (high-precision dots) for correctness checking.
# ----------------------------------------------------------------------------
_dot = functools.partial(jnp.dot, precision=jax.lax.Precision.HIGHEST)


def _gru_layer_ref(x_parts, wih, whh, bih, bhh, reverse):
    S, B, _ = x_parts[0].shape
    H = whh.shape[0]
    h = jnp.zeros((B, H), jnp.float32)
    ys = [None] * S
    order = range(S - 1, -1, -1) if reverse else range(S)
    for t in order:
        gx = sum(_dot(x_parts[p][t], wih[p]) for p in range(len(x_parts))) + bih
        gh = _dot(h, whh) + bhh
        r = jax.nn.sigmoid(gx[:, :H] + gh[:, :H])
        z = jax.nn.sigmoid(gx[:, H:2 * H] + gh[:, H:2 * H])
        n = jnp.tanh(gx[:, 2 * H:] + r * gh[:, 2 * H:])
        h = (1.0 - z) * n + z * h
        ys[t] = h
    return jnp.stack(ys, axis=0)


def _forward_ref(embedded, gru_params, out_weight, out_bias):
    x_parts = [jnp.transpose(embedded, (1, 0, 2))]
    y_f = y_b = None
    for layer in gru_params:
        y_f = _gru_layer_ref(x_parts, *layer["fwd"], reverse=False)
        y_b = _gru_layer_ref(x_parts, *layer["bwd"], reverse=True)
        x_parts = [y_f, y_b]
    hidden = jnp.concatenate([y_f[-1], y_b[0]], axis=-1)
    return _dot(hidden, out_weight.T) + out_bias


if __name__ == "__main__":
    key = jax.random.PRNGKey(0)
    batch, seq, hidden_size, num_layers = 2, 8, 32, 4

    keys = iter(jax.random.split(key, 64))
    bound = 1.0 / (hidden_size ** 0.5)

    def uni(shape):
        return jax.random.uniform(next(keys), shape, jnp.float32, -bound, bound)

    # stands in for albert(*input)[0]  (sequence output, shape [B, S, H])
    embedded = jax.random.normal(next(keys), (batch, seq, hidden_size), jnp.float32)

    gru_params = []
    for layer in range(num_layers):
        n_parts = 1 if layer == 0 else 2            # layer 0: x; layers>0: (y_fwd, y_bwd)
        layer_p = {}
        for direction in ("fwd", "bwd"):
            layer_p[direction] = (
                uni((n_parts, hidden_size, 3 * hidden_size)),  # W_ih^T fused (r|z|n), per part
                uni((hidden_size, 3 * hidden_size)),           # W_hh^T fused (r|z|n)
                uni((1, 3 * hidden_size)),                     # b_ih fused
                uni((1, 3 * hidden_size)),                     # b_hh fused
            )
        gru_params.append(layer_p)

    out_weight = uni((1, 2 * hidden_size))   # torch nn.Linear(2H, 1) weight layout
    out_bias = uni((1,))

    fwd = jax.jit(nsp_gru_forward)
    out = jax.block_until_ready(fwd(embedded, gru_params, out_weight, out_bias))

    expected = _forward_ref(embedded, gru_params, out_weight, out_bias)
    assert out.shape == (batch, 1), out.shape
    assert jnp.allclose(out, expected, atol=2e-3, rtol=2e-3), (
        float(jnp.max(jnp.abs(out - expected))))
    print("KERNEL_OK")
</pallas_src>

<mosaic_0001>
module attributes {stable_mosaic.version = 11 : i64} {
  func.func @kernel(%arg0: i32, %arg1: memref<16x32xf32, #tpu.memory_space<vmem>>, %arg2: memref<1x32x96xf32, #tpu.memory_space<vmem>>, %arg3: memref<1x96xf32, #tpu.memory_space<vmem>>, %arg4: memref<16x96xf32, #tpu.memory_space<vmem>>) attributes {dimension_semantics = [#tpu.dimension_semantics<parallel>], iteration_bounds = array<i64: 1>, scalar_prefetch = 0 : i64, scratch_operands = 0 : i64, tpu.core_type = #tpu.core_type<tc>, window_params = [{transform_indices = @transform_0, window_bounds = array<i64: 16, 32>}, {pipeline_mode = #tpu.pipeline_mode<synchronous>, transform_indices = @transform_1, window_bounds = array<i64: 1, 32, 96>}, {pipeline_mode = #tpu.pipeline_mode<synchronous>, transform_indices = @transform_2, window_bounds = array<i64: 1, 96>}, {transform_indices = @transform_3, window_bounds = array<i64: 16, 96>}]} {
    %c0 = arith.constant 0 : index
    %c0_0 = arith.constant 0 : index
    %0 = vector.load %arg1[%c0, %c0_0] : memref<16x32xf32, #tpu.memory_space<vmem>>, vector<16x32xf32>
    %c0_1 = arith.constant 0 : index
    %c0_2 = arith.constant 0 : index
    %c0_3 = arith.constant 0 : index
    %1 = vector.load %arg2[%c0_1, %c0_2, %c0_3] : memref<1x32x96xf32, #tpu.memory_space<vmem>>, vector<1x32x96xf32>
    %2 = vector.shape_cast %1 : vector<1x32x96xf32> to vector<32x96xf32>
    %cst = arith.constant dense<0.000000e+00> : vector<16x96xf32>
    %3 = tpu.matmul %0, %2, %cst {dimension_numbers = #tpu.dot_dimension_numbers<[1], [0], [0], [1], [0, 0, 1, 1], [], []>} : vector<16x32xf32>, vector<32x96xf32>, vector<16x96xf32> -> vector<16x96xf32>
    %c0_4 = arith.constant 0 : index
    %c0_5 = arith.constant 0 : index
    %4 = vector.load %arg3[%c0_4, %c0_5] : memref<1x96xf32, #tpu.memory_space<vmem>>, vector<1x96xf32>
    %5 = vector.broadcast %4 : vector<1x96xf32> to vector<16x96xf32>
    %6 = arith.addf %3, %5 : vector<16x96xf32>
    %c0_6 = arith.constant 0 : index
    %c0_7 = arith.constant 0 : index
    %7 = vector.load %arg4[%c0_6, %c0_7] : memref<16x96xf32, #tpu.memory_space<vmem>>, vector<16x96xf32>
    tpu.vector_store %arg4[%c0_6, %c0_7], %6 {strides = array<i32>} : memref<16x96xf32, #tpu.memory_space<vmem>>, vector<16x96xf32>,
    return
  }
  func.func @transform_0(%arg0: i32) -> (i32, i32) {
    %c0_i32 = arith.constant 0 : i32
    %c0_i32_0 = arith.constant 0 : i32
    return %arg0, %c0_i32 : i32, i32
  }
  func.func @transform_1(%arg0: i32) -> (i32, i32, i32) {
    %c0_i32 = arith.constant 0 : i32
    %c0_i32_0 = arith.constant 0 : i32
    %c0_i32_1 = arith.constant 0 : i32
    %c0_i32_2 = arith.constant 0 : i32
    return %c0_i32, %c0_i32_0, %c0_i32_1 : i32, i32, i32
  }
  func.func @transform_2(%arg0: i32) -> (i32, i32) {
    %c0_i32 = arith.constant 0 : i32
    %c0_i32_0 = arith.constant 0 : i32
    %c0_i32_1 = arith.constant 0 : i32
    return %c0_i32, %c0_i32_0 : i32, i32
  }
  func.func @transform_3(%arg0: i32) -> (i32, i32) {
    %c0_i32 = arith.constant 0 : i32
    %c0_i32_0 = arith.constant 0 : i32
    return %arg0, %c0_i32 : i32, i32
  }
}

module attributes {stable_mosaic.version = 11 : i64} {
  func.func @_gru_scan_kernel(%arg0: i32, %arg1: memref<8x2x96xf32, #tpu.memory_space<vmem>>, %arg2: memref<32x96xf32, #tpu.memory_space<any>>, %arg3: memref<1x96xf32, #tpu.memory_space<vmem>>, %arg4: memref<8x2x32xf32, #tpu.memory_space<vmem>>, %arg5: memref<2x32xf32, #tpu.memory_space<vmem>>, %arg6: memref<32x96xf32, #tpu.memory_space<vmem>>, %arg7: memref<!tpu.dma_semaphore, #tpu.memory_space<semaphore_mem>>) attributes {dimension_semantics = [#tpu.dimension_semantics<arbitrary>], iteration_bounds = array<i64: 1>, scalar_prefetch = 0 : i64, scratch_operands = 3 : i64, tpu.core_type = #tpu.core_type<tc>, window_params = [{transform_indices = @transform_0, window_bounds = array<i64: 8, 2, 96>}, {}, {pipeline_mode = #tpu.pipeline_mode<synchronous>, transform_indices = @transform_2, window_bounds = array<i64: 1, 96>}, {transform_indices = @transform_3, window_bounds = array<i64: 8, 2, 32>}]} {
    %c0_i32 = arith.constant 0 : i32
    %0 = arith.cmpi eq, %arg0, %c0_i32 : i32
    %1 = arith.extui %0 : i1 to i32
    %c0_i32_0 = arith.constant 0 : i32
    %2 = arith.cmpi ne, %1, %c0_i32_0 : i32
    scf.if %2 {
      %cst_80 = arith.constant 0.000000e+00 : f32
      %279 = vector.broadcast %cst_80 : f32 to vector<2x32xf32>
      %c0_81 = arith.constant 0 : index
      %c0_82 = arith.constant 0 : index
      %280 = vector.load %arg5[%c0_81, %c0_82] : memref<2x32xf32, #tpu.memory_space<vmem>>, vector<2x32xf32>
      tpu.vector_store %arg5[%c0_81, %c0_82], %279 {strides = array<i32>} : memref<2x32xf32, #tpu.memory_space<vmem>>, vector<2x32xf32>,
      tpu.enqueue_dma source(%arg2 : memref<32x96xf32, #tpu.memory_space<any>>) target(%arg6 : memref<32x96xf32, #tpu.memory_space<vmem>>) target_semaphore(%arg7 : memref<!tpu.dma_semaphore, #tpu.memory_space<semaphore_mem>>)
      tpu.wait_dma2 semaphore(%arg7 : memref<!tpu.dma_semaphore, #tpu.memory_space<semaphore_mem>>) src(%arg2 : memref<32x96xf32, #tpu.memory_space<any>>) dst(%arg6 : memref<32x96xf32, #tpu.memory_space<vmem>>)
    } else {
    }
    %c0 = arith.constant 0 : index
    %c0_1 = arith.constant 0 : index
    %3 = vector.load %arg6[%c0, %c0_1] : memref<32x96xf32, #tpu.memory_space<vmem>>, vector<32x96xf32>
    %c0_2 = arith.constant 0 : index
    %c0_3 = arith.constant 0 : index
    %4 = vector.load %arg3[%c0_2, %c0_3] : memref<1x96xf32, #tpu.memory_space<vmem>>, vector<1x96xf32>
    %c0_4 = arith.constant 0 : index
    %c0_5 = arith.constant 0 : index
    %5 = vector.load %arg5[%c0_4, %c0_5] : memref<2x32xf32, #tpu.memory_space<vmem>>, vector<2x32xf32>
    %c0_6 = arith.constant 0 : index
    %c0_7 = arith.constant 0 : index
    %c0_8 = arith.constant 0 : index
    %6 = vector.load %arg1[%c0_6, %c0_7, %c0_8] : memref<8x2x96xf32, #tpu.memory_space<vmem>>, vector<1x2x96xf32>
    %7 = vector.shape_cast %6 : vector<1x2x96xf32> to vector<2x96xf32>
    %cst = arith.constant dense<0.000000e+00> : vector<2x96xf32>
    %8 = tpu.matmul %5, %3, %cst {dimension_numbers = #tpu.dot_dimension_numbers<[1], [0], [0], [1], [0, 0, 1, 1], [], []>} : vector<2x32xf32>, vector<32x96xf32>, vector<2x96xf32> -> vector<2x96xf32>
    %9 = vector.broadcast %4 : vector<1x96xf32> to vector<2x96xf32>
    %10 = arith.addf %8, %9 : vector<2x96xf32>
    %11 = vector.extract_strided_slice %7 {offsets = [0, 0], sizes = [2, 32], strides = [1, 1]} : vector<2x96xf32> to vector<2x32xf32>
    %12 = vector.extract_strided_slice %10 {offsets = [0, 0], sizes = [2, 32], strides = [1, 1]} : vector<2x96xf32> to vector<2x32xf32>
    %13 = arith.addf %11, %12 : vector<2x32xf32>
    %14 = arith.negf %13 : vector<2x32xf32>
    %15 = math.exp %14 : vector<2x32xf32>
    %cst_9 = arith.constant 1.000000e+00 : f32
    %16 = vector.broadcast %cst_9 : f32 to vector<2x32xf32>
    %17 = arith.addf %16, %15 : vector<2x32xf32>
    %18 = arith.divf %16, %17 : vector<2x32xf32>
    %19 = vector.extract_strided_slice %7 {offsets = [0, 32], sizes = [2, 32], strides = [1, 1]} : vector<2x96xf32> to vector<2x32xf32>
    %20 = vector.extract_strided_slice %10 {offsets = [0, 32], sizes = [2, 32], strides = [1, 1]} : vector<2x96xf32> to vector<2x32xf32>
    %21 = arith.addf %19, %20 : vector<2x32xf32>
    %22 = arith.negf %21 : vector<2x32xf32>
    %23 = math.exp %22 : vector<2x32xf32>
    %cst_10 = arith.constant 1.000000e+00 : f32
    %24 = vector.broadcast %cst_10 : f32 to vector<2x32xf32>
    %25 = arith.addf %24, %23 : vector<2x32xf32>
    %26 = arith.divf %24, %25 : vector<2x32xf32>
    %27 = vector.extract_strided_slice %7 {offsets = [0, 64], sizes = [2, 32], strides = [1, 1]} : vector<2x96xf32> to vector<2x32xf32>
    %28 = vector.extract_strided_slice %10 {offsets = [0, 64], sizes = [2, 32], strides = [1, 1]} : vector<2x96xf32> to vector<2x32xf32>
    %29 = arith.mulf %18, %28 : vector<2x32xf32>
    %30 = arith.addf %27, %29 : vector<2x32xf32>
    %31 = math.tanh %30 : vector<2x32xf32>
    %cst_11 = arith.constant 1.000000e+00 : f32
    %32 = vector.broadcast %cst_11 : f32 to vector<2x32xf32>
    %33 = arith.subf %32, %26 : vector<2x32xf32>
    %34 = arith.mulf %33, %31 : vector<2x32xf32>
    %35 = arith.mulf %26, %5 : vector<2x32xf32>
    %36 = arith.addf %34, %35 : vector<2x32xf32>
    %c0_12 = arith.constant 0 : index
    %c0_13 = arith.constant 0 : index
    %c0_14 = arith.constant 0 : index
    %37 = vector.load %arg4[%c0_12, %c0_13, %c0_14] : memref<8x2x32xf32, #tpu.memory_space<vmem>>, vector<1x2x32xf32>
    %38 = vector.shape_cast %37 : vector<1x2x32xf32> to vector<2x32xf32>
    %39 = vector.shape_cast %36 : vector<2x32xf32> to vector<1x2x32xf32>
    tpu.vector_store %arg4[%c0_12, %c0_13, %c0_14], %39 {strides = array<i32>} : memref<8x2x32xf32, #tpu.memory_space<vmem>>, vector<1x2x32xf32>,
    %c1 = arith.constant 1 : index
    %c0_15 = arith.constant 0 : index
    %c0_16 = arith.constant 0 : index
    %40 = vector.load %arg1[%c1, %c0_15, %c0_16] : memref<8x2x96xf32, #tpu.memory_space<vmem>>, vector<1x2x96xf32>
    %41 = vector.shape_cast %40 : vector<1x2x96xf32> to vector<2x96xf32>
    %cst_17 = arith.constant dense<0.000000e+00> : vector<2x96xf32>
    %42 = tpu.matmul %36, %3, %cst_17 {dimension_numbers = #tpu.dot_dimension_numbers<[1], [0], [0], [1], [0, 0, 1, 1], [], []>} : vector<2x32xf32>, vector<32x96xf32>, vector<2x96xf32> -> vector<2x96xf32>
    %43 = vector.broadcast %4 : vector<1x96xf32> to vector<2x96xf32>
    %44 = arith.addf %42, %43 : vector<2x96xf32>
    %45 = vector.extract_strided_slice %41 {offsets = [0, 0], sizes = [2, 32], strides = [1, 1]} : vector<2x96xf32> to vector<2x32xf32>
    %46 = vector.extract_strided_slice %44 {offsets = [0, 0], sizes = [2, 32], strides = [1, 1]} : vector<2x96xf32> to vector<2x32xf32>
    %47 = arith.addf %45, %46 : vector<2x32xf32>
    %48 = arith.negf %47 : vector<2x32xf32>
    %49 = math.exp %48 : vector<2x32xf32>
    %cst_18 = arith.constant 1.000000e+00 : f32
    %50 = vector.broadcast %cst_18 : f32 to vector<2x32xf32>
    %51 = arith.addf %50, %49 : vector<2x32xf32>
    %52 = arith.divf %50, %51 : vector<2x32xf32>
    %53 = vector.extract_strided_slice %41 {offsets = [0, 32], sizes = [2, 32], strides = [1, 1]} : vector<2x96xf32> to vector<2x32xf32>
    %54 = vector.extract_strided_slice %44 {offsets = [0, 32], sizes = [2, 32], strides = [1, 1]} : vector<2x96xf32> to vector<2x32xf32>
    %55 = arith.addf %53, %54 : vector<2x32xf32>
    %56 = arith.negf %55 : vector<2x32xf32>
    %57 = math.exp %56 : vector<2x32xf32>
    %cst_19 = arith.constant 1.000000e+00 : f32
    %58 = vector.broadcast %cst_19 : f32 to vector<2x32xf32>
    %59 = arith.addf %58, %57 : vector<2x32xf32>
    %60 = arith.divf %58, %59 : vector<2x32xf32>
    %61 = vector.extract_strided_slice %41 {offsets = [0, 64], sizes = [2, 32], strides = [1, 1]} : vector<2x96xf32> to vector<2x32xf32>
    %62 = vector.extract_strided_slice %44 {offsets = [0, 64], sizes = [2, 32], strides = [1, 1]} : vector<2x96xf32> to vector<2x32xf32>
    %63 = arith.mulf %52, %62 : vector<2x32xf32>
    %64 = arith.addf %61, %63 : vector<2x32xf32>
    %65 = math.tanh %64 : vector<2x32xf32>
    %cst_20 = arith.constant 1.000000e+00 : f32
    %66 = vector.broadcast %cst_20 : f32 to vector<2x32xf32>
    %67 = arith.subf %66, %60 : vector<2x32xf32>
    %68 = arith.mulf %67, %65 : vector<2x32xf32>
    %69 = arith.mulf %60, %36 : vector<2x32xf32>
    %70 = arith.addf %68, %69 : vector<2x32xf32>
    %c1_21 = arith.constant 1 : index
    %c0_22 = arith.constant 0 : index
    %c0_23 = arith.constant 0 : index
    %71 = vector.load %arg4[%c1_21, %c0_22, %c0_23] : memref<8x2x32xf32, #tpu.memory_space<vmem>>, vector<1x2x32xf32>
    %72 = vector.shape_cast %71 : vector<1x2x32xf32> to vector<2x32xf32>
    %73 = vector.shape_cast %70 : vector<2x32xf32> to vector<1x2x32xf32>
    tpu.vector_store %arg4[%c1_21, %c0_22, %c0_23], %73 {strides = array<i32>} : memref<8x2x32xf32, #tpu.memory_space<vmem>>, vector<1x2x32xf32>,
    %c2 = arith.constant 2 : index
    %c0_24 = arith.constant 0 : index
    %c0_25 = arith.constant 0 : index
    %74 = vector.load %arg1[%c2, %c0_24, %c0_25] : memref<8x2x96xf32, #tpu.memory_space<vmem>>, vector<1x2x96xf32>
    %75 = vector.shape_cast %74 : vector<1x2x96xf32> to vector<2x96xf32>
    %cst_26 = arith.constant dense<0.000000e+00> : vector<2x96xf32>
    %76 = tpu.matmul %70, %3, %cst_26 {dimension_numbers = #tpu.dot_dimension_numbers<[1], [0], [0], [1], [0, 0, 1, 1], [], []>} : vector<2x32xf32>, vector<32x96xf32>, vector<2x96xf32> -> vector<2x96xf32>
    %77 = vector.broadcast %4 : vector<1x96xf32> to vector<2x96xf32>
    %78 = arith.addf %76, %77 : vector<2x96xf32>
    %79 = vector.extract_strided_slice %75 {offsets = [0, 0], sizes = [2, 32], strides = [1, 1]} : vector<2x96xf32> to vector<2x32xf32>
    %80 = vector.extract_strided_slice %78 {offsets = [0, 0], sizes = [2, 32], strides = [1, 1]} : vector<2x96xf32> to vector<2x32xf32>
    %81 = arith.addf %79, %80 : vector<2x32xf32>
    %82 = arith.negf %81 : vector<2x32xf32>
    %83 = math.exp %82 : vector<2x32xf32>
    %cst_27 = arith.constant 1.000000e+00 : f32
    %84 = vector.broadcast %cst_27 : f32 to vector<2x32xf32>
    %85 = arith.addf %84, %83 : vector<2x32xf32>
    %86 = arith.divf %84, %85 : vector<2x32xf32>
    %87 = vector.extract_strided_slice %75 {offsets = [0, 32], sizes = [2, 32], strides = [1, 1]} : vector<2x96xf32> to vector<2x32xf32>
    %88 = vector.extract_strided_slice %78 {offsets = [0, 32], sizes = [2, 32], strides = [1, 1]} : vector<2x96xf32> to vector<2x32xf32>
    %89 = arith.addf %87, %88 : vector<2x32xf32>
    %90 = arith.negf %89 : vector<2x32xf32>
    %91 = math.exp %90 : vector<2x32xf32>
    %cst_28 = arith.constant 1.000000e+00 : f32
    %92 = vector.broadcast %cst_28 : f32 to vector<2x32xf32>
    %93 = arith.addf %92, %91 : vector<2x32xf32>
    %94 = arith.divf %92, %93 : vector<2x32xf32>
    %95 = vector.extract_strided_slice %75 {offsets = [0, 64], sizes = [2, 32], strides = [1, 1]} : vector<2x96xf32> to vector<2x32xf32>
    %96 = vector.extract_strided_slice %78 {offsets = [0, 64], sizes = [2, 32], strides = [1, 1]} : vector<2x96xf32> to vector<2x32xf32>
    %97 = arith.mulf %86, %96 : vector<2x32xf32>
    %98 = arith.addf %95, %97 : vector<2x32xf32>
    %99 = math.tanh %98 : vector<2x32xf32>
    %cst_29 = arith.constant 1.000000e+00 : f32
    %100 = vector.broadcast %cst_29 : f32 to vector<2x32xf32>
    %101 = arith.subf %100, %94 : vector<2x32xf32>
    %102 = arith.mulf %101, %99 : vector<2x32xf32>
    %103 = arith.mulf %94, %70 : vector<2x32xf32>
    %104 = arith.addf %102, %103 : vector<2x32xf32>
    %c2_30 = arith.constant 2 : index
    %c0_31 = arith.constant 0 : index
    %c0_32 = arith.constant 0 : index
    %105 = vector.load %arg4[%c2_30, %c0_31, %c0_32] : memref<8x2x32xf32, #tpu.memory_space<vmem>>, vector<1x2x32xf32>
    %106 = vector.shape_cast %105 : vector<1x2x32xf32> to vector<2x32xf32>
    %107 = vector.shape_cast %104 : vector<2x32xf32> to vector<1x2x32xf32>
    tpu.vector_store %arg4[%c2_30, %c0_31, %c0_32], %107 {strides = array<i32>} : memref<8x2x32xf32, #tpu.memory_space<vmem>>, vector<1x2x32xf32>,
    %c3 = arith.constant 3 : index
    %c0_33 = arith.constant 0 : index
    %c0_34 = arith.constant 0 : index
    %108 = vector.load %arg1[%c3, %c0_33, %c0_34] : memref<8x2x96xf32, #tpu.memory_space<vmem>>, vector<1x2x96xf32>
    %109 = vector.shape_cast %108 : vector<1x2x96xf32> to vector<2x96xf32>
    %cst_35 = arith.constant dense<0.000000e+00> : vector<2x96xf32>
    %110 = tpu.matmul %104, %3, %cst_35 {dimension_numbers = #tpu.dot_dimension_numbers<[1], [0], [0], [1], [0, 0, 1, 1], [], []>} : vector<2x32xf32>, vector<32x96xf32>, vector<2x96xf32> -> vector<2x96xf32>
    %111 = vector.broadcast %4 : vector<1x96xf32> to vector<2x96xf32>
    %112 = arith.addf %110, %111 : vector<2x96xf32>
    %113 = vector.extract_strided_slice %109 {offsets = [0, 0], sizes = [2, 32], strides = [1, 1]} : vector<2x96xf32> to vector<2x32xf32>
    %114 = vector.extract_strided_slice %112 {offsets = [0, 0], sizes = [2, 32], strides = [1, 1]} : vector<2x96xf32> to vector<2x32xf32>
    %115 = arith.addf %113, %114 : vector<2x32xf32>
    %116 = arith.negf %115 : vector<2x32xf32>
    %117 = math.exp %116 : vector<2x32xf32>
    %cst_36 = arith.constant 1.000000e+00 : f32
    %118 = vector.broadcast %cst_36 : f32 to vector<2x32xf32>
    %119 = arith.addf %118, %117 : vector<2x32xf32>
    %120 = arith.divf %118, %119 : vector<2x32xf32>
    %121 = vector.extract_strided_slice %109 {offsets = [0, 32], sizes = [2, 32], strides = [1, 1]} : vector<2x96xf32> to vector<2x32xf32>
    %122 = vector.extract_strided_slice %112 {offsets = [0, 32], sizes = [2, 32], strides = [1, 1]} : vector<2x96xf32> to vector<2x32xf32>
    %123 = arith.addf %121, %122 : vector<2x32xf32>
    %124 = arith.negf %123 : vector<2x32xf32>
    %125 = math.exp %124 : vector<2x32xf32>
    %cst_37 = arith.constant 1.000000e+00 : f32
    %126 = vector.broadcast %cst_37 : f32 to vector<2x32xf32>
    %127 = arith.addf %126, %125 : vector<2x32xf32>
    %128 = arith.divf %126, %127 : vector<2x32xf32>
    %129 = vector.extract_strided_slice %109 {offsets = [0, 64], sizes = [2, 32], strides = [1, 1]} : vector<2x96xf32> to vector<2x32xf32>
    %130 = vector.extract_strided_slice %112 {offsets = [0, 64], sizes = [2, 32], strides = [1, 1]} : vector<2x96xf32> to vector<2x32xf32>
    %131 = arith.mulf %120, %130 : vector<2x32xf32>
    %132 = arith.addf %129, %131 : vector<2x32xf32>
    %133 = math.tanh %132 : vector<2x32xf32>
    %cst_38 = arith.constant 1.000000e+00 : f32
    %134 = vector.broadcast %cst_38 : f32 to vector<2x32xf32>
    %135 = arith.subf %134, %128 : vector<2x32xf32>
    %136 = arith.mulf %135, %133 : vector<2x32xf32>
    %137 = arith.mulf %128, %104 : vector<2x32xf32>
    %138 = arith.addf %136, %137 : vector<2x32xf32>
    %c3_39 = arith.constant 3 : index
    %c0_40 = arith.constant 0 : index
    %c0_41 = arith.constant 0 : index
    %139 = vector.load %arg4[%c3_39, %c0_40, %c0_41] : memref<8x2x32xf32, #tpu.memory_space<vmem>>, vector<1x2x32xf32>
    %140 = vector.shape_cast %139 : vector<1x2x32xf32> to vector<2x32xf32>
    %141 = vector.shape_cast %138 : vector<2x32xf32> to vector<1x2x32xf32>
    tpu.vector_store %arg4[%c3_39, %c0_40, %c0_41], %141 {strides = array<i32>} : memref<8x2x32xf32, #tpu.memory_space<vmem>>, vector<1x2x32xf32>,
    %c4 = arith.constant 4 : index
    %c0_42 = arith.constant 0 : index
    %c0_43 = arith.constant 0 : index
    %142 = vector.load %arg1[%c4, %c0_42, %c0_43] : memref<8x2x96xf32, #tpu.memory_space<vmem>>, vector<1x2x96xf32>
    %143 = vector.shape_cast %142 : vector<1x2x96xf32> to vector<2x96xf32>
    %cst_44 = arith.constant dense<0.000000e+00> : vector<2x96xf32>
    %144 = tpu.matmul %138, %3, %cst_44 {dimension_numbers = #tpu.dot_dimension_numbers<[1], [0], [0], [1], [0, 0, 1, 1], [], []>} : vector<2x32xf32>, vector<32x96xf32>, vector<2x96xf32> -> vector<2x96xf32>
    %145 = vector.broadcast %4 : vector<1x96xf32> to vector<2x96xf32>
    %146 = arith.addf %144, %145 : vector<2x96xf32>
    %147 = vector.extract_strided_slice %143 {offsets = [0, 0], sizes = [2, 32], strides = [1, 1]} : vector<2x96xf32> to vector<2x32xf32>
    %148 = vector.extract_strided_slice %146 {offsets = [0, 0], sizes = [2, 32], strides = [1, 1]} : vector<2x96xf32> to vector<2x32xf32>
    %149 = arith.addf %147, %148 : vector<2x32xf32>
    %150 = arith.negf %149 : vector<2x32xf32>
    %151 = math.exp %150 : vector<2x32xf32>
    %cst_45 = arith.constant 1.000000e+00 : f32
    %152 = vector.broadcast %cst_45 : f32 to vector<2x32xf32>
    %153 = arith.addf %152, %151 : vector<2x32xf32>
    %154 = arith.divf %152, %153 : vector<2x32xf32>
    %155 = vector.extract_strided_slice %143 {offsets = [0, 32], sizes = [2, 32], strides = [1, 1]} : vector<2x96xf32> to vector<2x32xf32>
    %156 = vector.extract_strided_slice %146 {offsets = [0, 32], sizes = [2, 32], strides = [1, 1]} : vector<2x96xf32> to vector<2x32xf32>
    %157 = arith.addf %155, %156 : vector<2x32xf32>
    %158 = arith.negf %157 : vector<2x32xf32>
    %159 = math.exp %158 : vector<2x32xf32>
    %cst_46 = arith.constant 1.000000e+00 : f32
    %160 = vector.broadcast %cst_46 : f32 to vector<2x32xf32>
    %161 = arith.addf %160, %159 : vector<2x32xf32>
    %162 = arith.divf %160, %161 : vector<2x32xf32>
    %163 = vector.extract_strided_slice %143 {offsets = [0, 64], sizes = [2, 32], strides = [1, 1]} : vector<2x96xf32> to vector<2x32xf32>
    %164 = vector.extract_strided_slice %146 {offsets = [0, 64], sizes = [2, 32], strides = [1, 1]} : vector<2x96xf32> to vector<2x32xf32>
    %165 = arith.mulf %154, %164 : vector<2x32xf32>
    %166 = arith.addf %163, %165 : vector<2x32xf32>
    %167 = math.tanh %166 : vector<2x32xf32>
    %cst_47 = arith.constant 1.000000e+00 : f32
    %168 = vector.broadcast %cst_47 : f32 to vector<2x32xf32>
    %169 = arith.subf %168, %162 : vector<2x32xf32>
    %170 = arith.mulf %169, %167 : vector<2x32xf32>
    %171 = arith.mulf %162, %138 : vector<2x32xf32>
    %172 = arith.addf %170, %171 : vector<2x32xf32>
    %c4_48 = arith.constant 4 : index
    %c0_49 = arith.constant 0 : index
    %c0_50 = arith.constant 0 : index
    %173 = vector.load %arg4[%c4_48, %c0_49, %c0_50] : memref<8x2x32xf32, #tpu.memory_space<vmem>>, vector<1x2x32xf32>
    %174 = vector.shape_cast %173 : vector<1x2x32xf32> to vector<2x32xf32>
    %175 = vector.shape_cast %172 : vector<2x32xf32> to vector<1x2x32xf32>
    tpu.vector_store %arg4[%c4_48, %c0_49, %c0_50], %175 {strides = array<i32>} : memref<8x2x32xf32, #tpu.memory_space<vmem>>, vector<1x2x32xf32>,
    %c5 = arith.constant 5 : index
    %c0_51 = arith.constant 0 : index
    %c0_52 = arith.constant 0 : index
    %176 = vector.load %arg1[%c5, %c0_51, %c0_52] : memref<8x2x96xf32, #tpu.memory_space<vmem>>, vector<1x2x96xf32>
    %177 = vector.shape_cast %176 : vector<1x2x96xf32> to vector<2x96xf32>
    %cst_53 = arith.constant dense<0.000000e+00> : vector<2x96xf32>
    %178 = tpu.matmul %172, %3, %cst_53 {dimension_numbers = #tpu.dot_dimension_numbers<[1], [0], [0], [1], [0, 0, 1, 1], [], []>} : vector<2x32xf32>, vector<32x96xf32>, vector<2x96xf32> -> vector<2x96xf32>
    %179 = vector.broadcast %4 : vector<1x96xf32> to vector<2x96xf32>
    %180 = arith.addf %178, %179 : vector<2x96xf32>
    %181 = vector.extract_strided_slice %177 {offsets = [0, 0], sizes = [2, 32], strides = [1, 1]} : vector<2x96xf32> to vector<2x32xf32>
    %182 = vector.extract_strided_slice %180 {offsets = [0, 0], sizes = [2, 32], strides = [1, 1]} : vector<2x96xf32> to vector<2x32xf32>
    %183 = arith.addf %181, %182 : vector<2x32xf32>
    %184 = arith.negf %183 : vector<2x32xf32>
    %185 = math.exp %184 : vector<2x32xf32>
    %cst_54 = arith.constant 1.000000e+00 : f32
    %186 = vector.broadcast %cst_54 : f32 to vector<2x32xf32>
    %187 = arith.addf %186, %185 : vector<2x32xf32>
    %188 = arith.divf %186, %187 : vector<2x32xf32>
    %189 = vector.extract_strided_slice %177 {offsets = [0, 32], sizes = [2, 32], strides = [1, 1]} : vector<2x96xf32> to vector<2x32xf32>
    %190 = vector.extract_strided_slice %180 {offsets = [0, 32], sizes = [2, 32], strides = [1, 1]} : vector<2x96xf32> to vector<2x32xf32>
    %191 = arith.addf %189, %190 : vector<2x32xf32>
    %192 = arith.negf %191 : vector<2x32xf32>
    %193 = math.exp %192 : vector<2x32xf32>
    %cst_55 = arith.constant 1.000000e+00 : f32
    %194 = vector.broadcast %cst_55 : f32 to vector<2x32xf32>
    %195 = arith.addf %194, %193 : vector<2x32xf32>
    %196 = arith.divf %194, %195 : vector<2x32xf32>
    %197 = vector.extract_strided_slice %177 {offsets = [0, 64], sizes = [2, 32], strides = [1, 1]} : vector<2x96xf32> to vector<2x32xf32>
    %198 = vector.extract_strided_slice %180 {offsets = [0, 64], sizes = [2, 32], strides = [1, 1]} : vector<2x96xf32> to vector<2x32xf32>
    %199 = arith.mulf %188, %198 : vector<2x32xf32>
    %200 = arith.addf %197, %199 : vector<2x32xf32>
    %201 = math.tanh %200 : vector<2x32xf32>
    %cst_56 = arith.constant 1.000000e+00 : f32
    %202 = vector.broadcast %cst_56 : f32 to vector<2x32xf32>
    %203 = arith.subf %202, %196 : vector<2x32xf32>
    %204 = arith.mulf %203, %201 : vector<2x32xf32>
    %205 = arith.mulf %196, %172 : vector<2x32xf32>
    %206 = arith.addf %204, %205 : vector<2x32xf32>
    %c5_57 = arith.constant 5 : index
    %c0_58 = arith.constant 0 : index
    %c0_59 = arith.constant 0 : index
    %207 = vector.load %arg4[%c5_57, %c0_58, %c0_59] : memref<8x2x32xf32, #tpu.memory_space<vmem>>, vector<1x2x32xf32>
    %208 = vector.shape_cast %207 : vector<1x2x32xf32> to vector<2x32xf32>
    %209 = vector.shape_cast %206 : vector<2x32xf32> to vector<1x2x32xf32>
    tpu.vector_store %arg4[%c5_57, %c0_58, %c0_59], %209 {strides = array<i32>} : memref<8x2x32xf32, #tpu.memory_space<vmem>>, vector<1x2x32xf32>,
    %c6 = arith.constant 6 : index
    %c0_60 = arith.constant 0 : index
    %c0_61 = arith.constant 0 : index
    %210 = vector.load %arg1[%c6, %c0_60, %c0_61] : memref<8x2x96xf32, #tpu.memory_space<vmem>>, vector<1x2x96xf32>
    %211 = vector.shape_cast %210 : vector<1x2x96xf32> to vector<2x96xf32>
    %cst_62 = arith.constant dense<0.000000e+00> : vector<2x96xf32>
    %212 = tpu.matmul %206, %3, %cst_62 {dimension_numbers = #tpu.dot_dimension_numbers<[1], [0], [0], [1], [0, 0, 1, 1], [], []>} : vector<2x32xf32>, vector<32x96xf32>, vector<2x96xf32> -> vector<2x96xf32>
    %213 = vector.broadcast %4 : vector<1x96xf32> to vector<2x96xf32>
    %214 = arith.addf %212, %213 : vector<2x96xf32>
    %215 = vector.extract_strided_slice %211 {offsets = [0, 0], sizes = [2, 32], strides = [1, 1]} : vector<2x96xf32> to vector<2x32xf32>
    %216 = vector.extract_strided_slice %214 {offsets = [0, 0], sizes = [2, 32], strides = [1, 1]} : vector<2x96xf32> to vector<2x32xf32>
    %217 = arith.addf %215, %216 : vector<2x32xf32>
    %218 = arith.negf %217 : vector<2x32xf32>
    %219 = math.exp %218 : vector<2x32xf32>
    %cst_63 = arith.constant 1.000000e+00 : f32
    %220 = vector.broadcast %cst_63 : f32 to vector<2x32xf32>
    %221 = arith.addf %220, %219 : vector<2x32xf32>
    %222 = arith.divf %220, %221 : vector<2x32xf32>
    %223 = vector.extract_strided_slice %211 {offsets = [0, 32], sizes = [2, 32], strides = [1, 1]} : vector<2x96xf32> to vector<2x32xf32>
    %224 = vector.extract_strided_slice %214 {offsets = [0, 32], sizes = [2, 32], strides = [1, 1]} : vector<2x96xf32> to vector<2x32xf32>
    %225 = arith.addf %223, %224 : vector<2x32xf32>
    %226 = arith.negf %225 : vector<2x32xf32>
    %227 = math.exp %226 : vector<2x32xf32>
    %cst_64 = arith.constant 1.000000e+00 : f32
    %228 = vector.broadcast %cst_64 : f32 to vector<2x32xf32>
    %229 = arith.addf %228, %227 : vector<2x32xf32>
    %230 = arith.divf %228, %229 : vector<2x32xf32>
    %231 = vector.extract_strided_slice %211 {offsets = [0, 64], sizes = [2, 32], strides = [1, 1]} : vector<2x96xf32> to vector<2x32xf32>
    %232 = vector.extract_strided_slice %214 {offsets = [0, 64], sizes = [2, 32], strides = [1, 1]} : vector<2x96xf32> to vector<2x32xf32>
    %233 = arith.mulf %222, %232 : vector<2x32xf32>
    %234 = arith.addf %231, %233 : vector<2x32xf32>
    %235 = math.tanh %234 : vector<2x32xf32>
    %cst_65 = arith.constant 1.000000e+00 : f32
    %236 = vector.broadcast %cst_65 : f32 to vector<2x32xf32>
    %237 = arith.subf %236, %230 : vector<2x32xf32>
    %238 = arith.mulf %237, %235 : vector<2x32xf32>
    %239 = arith.mulf %230, %206 : vector<2x32xf32>
    %240 = arith.addf %238, %239 : vector<2x32xf32>
    %c6_66 = arith.constant 6 : index
    %c0_67 = arith.constant 0 : index
    %c0_68 = arith.constant 0 : index
    %241 = vector.load %arg4[%c6_66, %c0_67, %c0_68] : memref<8x2x32xf32, #tpu.memory_space<vmem>>, vector<1x2x32xf32>
    %242 = vector.shape_cast %241 : vector<1x2x32xf32> to vector<2x32xf32>
    %243 = vector.shape_cast %240 : vector<2x32xf32> to vector<1x2x32xf32>
    tpu.vector_store %arg4[%c6_66, %c0_67, %c0_68], %243 {strides = array<i32>} : memref<8x2x32xf32, #tpu.memory_space<vmem>>, vector<1x2x32xf32>,
    %c7 = arith.constant 7 : index
    %c0_69 = arith.constant 0 : index
    %c0_70 = arith.constant 0 : index
    %244 = vector.load %arg1[%c7, %c0_69, %c0_70] : memref<8x2x96xf32, #tpu.memory_space<vmem>>, vector<1x2x96xf32>
    %245 = vector.shape_cast %244 : vector<1x2x96xf32> to vector<2x96xf32>
    %cst_71 = arith.constant dense<0.000000e+00> : vector<2x96xf32>
    %246 = tpu.matmul %240, %3, %cst_71 {dimension_numbers = #tpu.dot_dimension_numbers<[1], [0], [0], [1], [0, 0, 1, 1], [], []>} : vector<2x32xf32>, vector<32x96xf32>, vector<2x96xf32> -> vector<2x96xf32>
    %247 = vector.broadcast %4 : vector<1x96xf32> to vector<2x96xf32>
    %248 = arith.addf %246, %247 : vector<2x96xf32>
    %249 = vector.extract_strided_slice %245 {offsets = [0, 0], sizes = [2, 32], strides = [1, 1]} : vector<2x96xf32> to vector<2x32xf32>
    %250 = vector.extract_strided_slice %248 {offsets = [0, 0], sizes = [2, 32], strides = [1, 1]} : vector<2x96xf32> to vector<2x32xf32>
    %251 = arith.addf %249, %250 : vector<2x32xf32>
    %252 = arith.negf %251 : vector<2x32xf32>
    %253 = math.exp %252 : vector<2x32xf32>
    %cst_72 = arith.constant 1.000000e+00 : f32
    %254 = vector.broadcast %cst_72 : f32 to vector<2x32xf32>
    %255 = arith.addf %254, %253 : vector<2x32xf32>
    %256 = arith.divf %254, %255 : vector<2x32xf32>
    %257 = vector.extract_strided_slice %245 {offsets = [0, 32], sizes = [2, 32], strides = [1, 1]} : vector<2x96xf32> to vector<2x32xf32>
    %258 = vector.extract_strided_slice %248 {offsets = [0, 32], sizes = [2, 32], strides = [1, 1]} : vector<2x96xf32> to vector<2x32xf32>
    %259 = arith.addf %257, %258 : vector<2x32xf32>
    %260 = arith.negf %259 : vector<2x32xf32>
    %261 = math.exp %260 : vector<2x32xf32>
    %cst_73 = arith.constant 1.000000e+00 : f32
    %262 = vector.broadcast %cst_73 : f32 to vector<2x32xf32>
    %263 = arith.addf %262, %261 : vector<2x32xf32>
    %264 = arith.divf %262, %263 : vector<2x32xf32>
    %265 = vector.extract_strided_slice %245 {offsets = [0, 64], sizes = [2, 32], strides = [1, 1]} : vector<2x96xf32> to vector<2x32xf32>
    %266 = vector.extract_strided_slice %248 {offsets = [0, 64], sizes = [2, 32], strides = [1, 1]} : vector<2x96xf32> to vector<2x32xf32>
    %267 = arith.mulf %256, %266 : vector<2x32xf32>
    %268 = arith.addf %265, %267 : vector<2x32xf32>
    %269 = math.tanh %268 : vector<2x32xf32>
    %cst_74 = arith.constant 1.000000e+00 : f32
    %270 = vector.broadcast %cst_74 : f32 to vector<2x32xf32>
    %271 = arith.subf %270, %264 : vector<2x32xf32>
    %272 = arith.mulf %271, %269 : vector<2x32xf32>
    %273 = arith.mulf %264, %240 : vector<2x32xf32>
    %274 = arith.addf %272, %273 : vector<2x32xf32>
    %c7_75 = arith.constant 7 : index
    %c0_76 = arith.constant 0 : index
    %c0_77 = arith.constant 0 : index
    %275 = vector.load %arg4[%c7_75, %c0_76, %c0_77] : memref<8x2x32xf32, #tpu.memory_space<vmem>>, vector<1x2x32xf32>
    %276 = vector.shape_cast %275 : vector<1x2x32xf32> to vector<2x32xf32>
    %277 = vector.shape_cast %274 : vector<2x32xf32> to vector<1x2x32xf32>
    tpu.vector_store %arg4[%c7_75, %c0_76, %c0_77], %277 {strides = array<i32>} : memref<8x2x32xf32, #tpu.memory_space<vmem>>, vector<1x2x32xf32>,
    %c0_78 = arith.constant 0 : index
    %c0_79 = arith.constant 0 : index
    %278 = vector.load %arg5[%c0_78, %c0_79] : memref<2x32xf32, #tpu.memory_space<vmem>>, vector<2x32xf32>
    tpu.vector_store %arg5[%c0_78, %c0_79], %274 {strides = array<i32>} : memref<2x32xf32, #tpu.memory_space<vmem>>, vector<2x32xf32>,
    return
  }
  func.func @transform_0(%arg0: i32) -> (i32, i32, i32) {
    %c0_i32 = arith.constant 0 : i32
    %c0_i32_0 = arith.constant 0 : i32
    %c0_i32_1 = arith.constant 0 : i32
    return %arg0, %c0_i32, %c0_i32_0 : i32, i32, i32
  }
  func.func @transform_2(%arg0: i32) -> (i32, i32) {
    %c0_i32 = arith.constant 0 : i32
    %c0_i32_0 = arith.constant 0 : i32
    %c0_i32_1 = arith.constant 0 : i32
    return %c0_i32, %c0_i32_0 : i32, i32
  }
  func.func @transform_3(%arg0: i32) -> (i32, i32, i32) {
    %c0_i32 = arith.constant 0 : i32
    %c0_i32_0 = arith.constant 0 : i32
    %c0_i32_1 = arith.constant 0 : i32
    return %arg0, %c0_i32, %c0_i32_0 : i32, i32, i32
  }
}

module attributes {stable_mosaic.version = 11 : i64} {
  func.func @_gru_scan_kernel(%arg0: i32, %arg1: memref<8x2x96xf32, #tpu.memory_space<vmem>>, %arg2: memref<32x96xf32, #tpu.memory_space<any>>, %arg3: memref<1x96xf32, #tpu.memory_space<vmem>>, %arg4: memref<8x2x32xf32, #tpu.memory_space<vmem>>, %arg5: memref<2x32xf32, #tpu.memory_space<vmem>>, %arg6: memref<32x96xf32, #tpu.memory_space<vmem>>, %arg7: memref<!tpu.dma_semaphore, #tpu.memory_space<semaphore_mem>>) attributes {dimension_semantics = [#tpu.dimension_semantics<arbitrary>], iteration_bounds = array<i64: 1>, scalar_prefetch = 0 : i64, scratch_operands = 3 : i64, tpu.core_type = #tpu.core_type<tc>, window_params = [{transform_indices = @transform_0, window_bounds = array<i64: 8, 2, 96>}, {}, {pipeline_mode = #tpu.pipeline_mode<synchronous>, transform_indices = @transform_2, window_bounds = array<i64: 1, 96>}, {transform_indices = @transform_3, window_bounds = array<i64: 8, 2, 32>}]} {
    %c0_i32 = arith.constant 0 : i32
    %0 = arith.cmpi eq, %arg0, %c0_i32 : i32
    %1 = arith.extui %0 : i1 to i32
    %c0_i32_0 = arith.constant 0 : i32
    %2 = arith.cmpi ne, %1, %c0_i32_0 : i32
    scf.if %2 {
      %cst_80 = arith.constant 0.000000e+00 : f32
      %279 = vector.broadcast %cst_80 : f32 to vector<2x32xf32>
      %c0_81 = arith.constant 0 : index
      %c0_82 = arith.constant 0 : index
      %280 = vector.load %arg5[%c0_81, %c0_82] : memref<2x32xf32, #tpu.memory_space<vmem>>, vector<2x32xf32>
      tpu.vector_store %arg5[%c0_81, %c0_82], %279 {strides = array<i32>} : memref<2x32xf32, #tpu.memory_space<vmem>>, vector<2x32xf32>,
      tpu.enqueue_dma source(%arg2 : memref<32x96xf32, #tpu.memory_space<any>>) target(%arg6 : memref<32x96xf32, #tpu.memory_space<vmem>>) target_semaphore(%arg7 : memref<!tpu.dma_semaphore, #tpu.memory_space<semaphore_mem>>)
      tpu.wait_dma2 semaphore(%arg7 : memref<!tpu.dma_semaphore, #tpu.memory_space<semaphore_mem>>) src(%arg2 : memref<32x96xf32, #tpu.memory_space<any>>) dst(%arg6 : memref<32x96xf32, #tpu.memory_space<vmem>>)
    } else {
    }
    %c0 = arith.constant 0 : index
    %c0_1 = arith.constant 0 : index
    %3 = vector.load %arg6[%c0, %c0_1] : memref<32x96xf32, #tpu.memory_space<vmem>>, vector<32x96xf32>
    %c0_2 = arith.constant 0 : index
    %c0_3 = arith.constant 0 : index
    %4 = vector.load %arg3[%c0_2, %c0_3] : memref<1x96xf32, #tpu.memory_space<vmem>>, vector<1x96xf32>
    %c0_4 = arith.constant 0 : index
    %c0_5 = arith.constant 0 : index
    %5 = vector.load %arg5[%c0_4, %c0_5] : memref<2x32xf32, #tpu.memory_space<vmem>>, vector<2x32xf32>
    %c7 = arith.constant 7 : index
    %c0_6 = arith.constant 0 : index
    %c0_7 = arith.constant 0 : index
    %6 = vector.load %arg1[%c7, %c0_6, %c0_7] : memref<8x2x96xf32, #tpu.memory_space<vmem>>, vector<1x2x96xf32>
    %7 = vector.shape_cast %6 : vector<1x2x96xf32> to vector<2x96xf32>
    %cst = arith.constant dense<0.000000e+00> : vector<2x96xf32>
    %8 = tpu.matmul %5, %3, %cst {dimension_numbers = #tpu.dot_dimension_numbers<[1], [0], [0], [1], [0, 0, 1, 1], [], []>} : vector<2x32xf32>, vector<32x96xf32>, vector<2x96xf32> -> vector<2x96xf32>
    %9 = vector.broadcast %4 : vector<1x96xf32> to vector<2x96xf32>
    %10 = arith.addf %8, %9 : vector<2x96xf32>
    %11 = vector.extract_strided_slice %7 {offsets = [0, 0], sizes = [2, 32], strides = [1, 1]} : vector<2x96xf32> to vector<2x32xf32>
    %12 = vector.extract_strided_slice %10 {offsets = [0, 0], sizes = [2, 32], strides = [1, 1]} : vector<2x96xf32> to vector<2x32xf32>
    %13 = arith.addf %11, %12 : vector<2x32xf32>
    %14 = arith.negf %13 : vector<2x32xf32>
    %15 = math.exp %14 : vector<2x32xf32>
    %cst_8 = arith.constant 1.000000e+00 : f32
    %16 = vector.broadcast %cst_8 : f32 to vector<2x32xf32>
    %17 = arith.addf %16, %15 : vector<2x32xf32>
    %18 = arith.divf %16, %17 : vector<2x32xf32>
    %19 = vector.extract_strided_slice %7 {offsets = [0, 32], sizes = [2, 32], strides = [1, 1]} : vector<2x96xf32> to vector<2x32xf32>
    %20 = vector.extract_strided_slice %10 {offsets = [0, 32], sizes = [2, 32], strides = [1, 1]} : vector<2x96xf32> to vector<2x32xf32>
    %21 = arith.addf %19, %20 : vector<2x32xf32>
    %22 = arith.negf %21 : vector<2x32xf32>
    %23 = math.exp %22 : vector<2x32xf32>
    %cst_9 = arith.constant 1.000000e+00 : f32
    %24 = vector.broadcast %cst_9 : f32 to vector<2x32xf32>
    %25 = arith.addf %24, %23 : vector<2x32xf32>
    %26 = arith.divf %24, %25 : vector<2x32xf32>
    %27 = vector.extract_strided_slice %7 {offsets = [0, 64], sizes = [2, 32], strides = [1, 1]} : vector<2x96xf32> to vector<2x32xf32>
    %28 = vector.extract_strided_slice %10 {offsets = [0, 64], sizes = [2, 32], strides = [1, 1]} : vector<2x96xf32> to vector<2x32xf32>
    %29 = arith.mulf %18, %28 : vector<2x32xf32>
    %30 = arith.addf %27, %29 : vector<2x32xf32>
    %31 = math.tanh %30 : vector<2x32xf32>
    %cst_10 = arith.constant 1.000000e+00 : f32
    %32 = vector.broadcast %cst_10 : f32 to vector<2x32xf32>
    %33 = arith.subf %32, %26 : vector<2x32xf32>
    %34 = arith.mulf %33, %31 : vector<2x32xf32>
    %35 = arith.mulf %26, %5 : vector<2x32xf32>
    %36 = arith.addf %34, %35 : vector<2x32xf32>
    %c7_11 = arith.constant 7 : index
    %c0_12 = arith.constant 0 : index
    %c0_13 = arith.constant 0 : index
    %37 = vector.load %arg4[%c7_11, %c0_12, %c0_13] : memref<8x2x32xf32, #tpu.memory_space<vmem>>, vector<1x2x32xf32>
    %38 = vector.shape_cast %37 : vector<1x2x32xf32> to vector<2x32xf32>
    %39 = vector.shape_cast %36 : vector<2x32xf32> to vector<1x2x32xf32>
    tpu.vector_store %arg4[%c7_11, %c0_12, %c0_13], %39 {strides = array<i32>} : memref<8x2x32xf32, #tpu.memory_space<vmem>>, vector<1x2x32xf32>,
    %c6 = arith.constant 6 : index
    %c0_14 = arith.constant 0 : index
    %c0_15 = arith.constant 0 : index
    %40 = vector.load %arg1[%c6, %c0_14, %c0_15] : memref<8x2x96xf32, #tpu.memory_space<vmem>>, vector<1x2x96xf32>
    %41 = vector.shape_cast %40 : vector<1x2x96xf32> to vector<2x96xf32>
    %cst_16 = arith.constant dense<0.000000e+00> : vector<2x96xf32>
    %42 = tpu.matmul %36, %3, %cst_16 {dimension_numbers = #tpu.dot_dimension_numbers<[1], [0], [0], [1], [0, 0, 1, 1], [], []>} : vector<2x32xf32>, vector<32x96xf32>, vector<2x96xf32> -> vector<2x96xf32>
    %43 = vector.broadcast %4 : vector<1x96xf32> to vector<2x96xf32>
    %44 = arith.addf %42, %43 : vector<2x96xf32>
    %45 = vector.extract_strided_slice %41 {offsets = [0, 0], sizes = [2, 32], strides = [1, 1]} : vector<2x96xf32> to vector<2x32xf32>
    %46 = vector.extract_strided_slice %44 {offsets = [0, 0], sizes = [2, 32], strides = [1, 1]} : vector<2x96xf32> to vector<2x32xf32>
    %47 = arith.addf %45, %46 : vector<2x32xf32>
    %48 = arith.negf %47 : vector<2x32xf32>
    %49 = math.exp %48 : vector<2x32xf32>
    %cst_17 = arith.constant 1.000000e+00 : f32
    %50 = vector.broadcast %cst_17 : f32 to vector<2x32xf32>
    %51 = arith.addf %50, %49 : vector<2x32xf32>
    %52 = arith.divf %50, %51 : vector<2x32xf32>
    %53 = vector.extract_strided_slice %41 {offsets = [0, 32], sizes = [2, 32], strides = [1, 1]} : vector<2x96xf32> to vector<2x32xf32>
    %54 = vector.extract_strided_slice %44 {offsets = [0, 32], sizes = [2, 32], strides = [1, 1]} : vector<2x96xf32> to vector<2x32xf32>
    %55 = arith.addf %53, %54 : vector<2x32xf32>
    %56 = arith.negf %55 : vector<2x32xf32>
    %57 = math.exp %56 : vector<2x32xf32>
    %cst_18 = arith.constant 1.000000e+00 : f32
    %58 = vector.broadcast %cst_18 : f32 to vector<2x32xf32>
    %59 = arith.addf %58, %57 : vector<2x32xf32>
    %60 = arith.divf %58, %59 : vector<2x32xf32>
    %61 = vector.extract_strided_slice %41 {offsets = [0, 64], sizes = [2, 32], strides = [1, 1]} : vector<2x96xf32> to vector<2x32xf32>
    %62 = vector.extract_strided_slice %44 {offsets = [0, 64], sizes = [2, 32], strides = [1, 1]} : vector<2x96xf32> to vector<2x32xf32>
    %63 = arith.mulf %52, %62 : vector<2x32xf32>
    %64 = arith.addf %61, %63 : vector<2x32xf32>
    %65 = math.tanh %64 : vector<2x32xf32>
    %cst_19 = arith.constant 1.000000e+00 : f32
    %66 = vector.broadcast %cst_19 : f32 to vector<2x32xf32>
    %67 = arith.subf %66, %60 : vector<2x32xf32>
    %68 = arith.mulf %67, %65 : vector<2x32xf32>
    %69 = arith.mulf %60, %36 : vector<2x32xf32>
    %70 = arith.addf %68, %69 : vector<2x32xf32>
    %c6_20 = arith.constant 6 : index
    %c0_21 = arith.constant 0 : index
    %c0_22 = arith.constant 0 : index
    %71 = vector.load %arg4[%c6_20, %c0_21, %c0_22] : memref<8x2x32xf32, #tpu.memory_space<vmem>>, vector<1x2x32xf32>
    %72 = vector.shape_cast %71 : vector<1x2x32xf32> to vector<2x32xf32>
    %73 = vector.shape_cast %70 : vector<2x32xf32> to vector<1x2x32xf32>
    tpu.vector_store %arg4[%c6_20, %c0_21, %c0_22], %73 {strides = array<i32>} : memref<8x2x32xf32, #tpu.memory_space<vmem>>, vector<1x2x32xf32>,
    %c5 = arith.constant 5 : index
    %c0_23 = arith.constant 0 : index
    %c0_24 = arith.constant 0 : index
    %74 = vector.load %arg1[%c5, %c0_23, %c0_24] : memref<8x2x96xf32, #tpu.memory_space<vmem>>, vector<1x2x96xf32>
    %75 = vector.shape_cast %74 : vector<1x2x96xf32> to vector<2x96xf32>
    %cst_25 = arith.constant dense<0.000000e+00> : vector<2x96xf32>
    %76 = tpu.matmul %70, %3, %cst_25 {dimension_numbers = #tpu.dot_dimension_numbers<[1], [0], [0], [1], [0, 0, 1, 1], [], []>} : vector<2x32xf32>, vector<32x96xf32>, vector<2x96xf32> -> vector<2x96xf32>
    %77 = vector.broadcast %4 : vector<1x96xf32> to vector<2x96xf32>
    %78 = arith.addf %76, %77 : vector<2x96xf32>
    %79 = vector.extract_strided_slice %75 {offsets = [0, 0], sizes = [2, 32], strides = [1, 1]} : vector<2x96xf32> to vector<2x32xf32>
    %80 = vector.extract_strided_slice %78 {offsets = [0, 0], sizes = [2, 32], strides = [1, 1]} : vector<2x96xf32> to vector<2x32xf32>
    %81 = arith.addf %79, %80 : vector<2x32xf32>
    %82 = arith.negf %81 : vector<2x32xf32>
    %83 = math.exp %82 : vector<2x32xf32>
    %cst_26 = arith.constant 1.000000e+00 : f32
    %84 = vector.broadcast %cst_26 : f32 to vector<2x32xf32>
    %85 = arith.addf %84, %83 : vector<2x32xf32>
    %86 = arith.divf %84, %85 : vector<2x32xf32>
    %87 = vector.extract_strided_slice %75 {offsets = [0, 32], sizes = [2, 32], strides = [1, 1]} : vector<2x96xf32> to vector<2x32xf32>
    %88 = vector.extract_strided_slice %78 {offsets = [0, 32], sizes = [2, 32], strides = [1, 1]} : vector<2x96xf32> to vector<2x32xf32>
    %89 = arith.addf %87, %88 : vector<2x32xf32>
    %90 = arith.negf %89 : vector<2x32xf32>
    %91 = math.exp %90 : vector<2x32xf32>
    %cst_27 = arith.constant 1.000000e+00 : f32
    %92 = vector.broadcast %cst_27 : f32 to vector<2x32xf32>
    %93 = arith.addf %92, %91 : vector<2x32xf32>
    %94 = arith.divf %92, %93 : vector<2x32xf32>
    %95 = vector.extract_strided_slice %75 {offsets = [0, 64], sizes = [2, 32], strides = [1, 1]} : vector<2x96xf32> to vector<2x32xf32>
    %96 = vector.extract_strided_slice %78 {offsets = [0, 64], sizes = [2, 32], strides = [1, 1]} : vector<2x96xf32> to vector<2x32xf32>
    %97 = arith.mulf %86, %96 : vector<2x32xf32>
    %98 = arith.addf %95, %97 : vector<2x32xf32>
    %99 = math.tanh %98 : vector<2x32xf32>
    %cst_28 = arith.constant 1.000000e+00 : f32
    %100 = vector.broadcast %cst_28 : f32 to vector<2x32xf32>
    %101 = arith.subf %100, %94 : vector<2x32xf32>
    %102 = arith.mulf %101, %99 : vector<2x32xf32>
    %103 = arith.mulf %94, %70 : vector<2x32xf32>
    %104 = arith.addf %102, %103 : vector<2x32xf32>
    %c5_29 = arith.constant 5 : index
    %c0_30 = arith.constant 0 : index
    %c0_31 = arith.constant 0 : index
    %105 = vector.load %arg4[%c5_29, %c0_30, %c0_31] : memref<8x2x32xf32, #tpu.memory_space<vmem>>, vector<1x2x32xf32>
    %106 = vector.shape_cast %105 : vector<1x2x32xf32> to vector<2x32xf32>
    %107 = vector.shape_cast %104 : vector<2x32xf32> to vector<1x2x32xf32>
    tpu.vector_store %arg4[%c5_29, %c0_30, %c0_31], %107 {strides = array<i32>} : memref<8x2x32xf32, #tpu.memory_space<vmem>>, vector<1x2x32xf32>,
    %c4 = arith.constant 4 : index
    %c0_32 = arith.constant 0 : index
    %c0_33 = arith.constant 0 : index
    %108 = vector.load %arg1[%c4, %c0_32, %c0_33] : memref<8x2x96xf32, #tpu.memory_space<vmem>>, vector<1x2x96xf32>
    %109 = vector.shape_cast %108 : vector<1x2x96xf32> to vector<2x96xf32>
    %cst_34 = arith.constant dense<0.000000e+00> : vector<2x96xf32>
    %110 = tpu.matmul %104, %3, %cst_34 {dimension_numbers = #tpu.dot_dimension_numbers<[1], [0], [0], [1], [0, 0, 1, 1], [], []>} : vector<2x32xf32>, vector<32x96xf32>, vector<2x96xf32> -> vector<2x96xf32>
    %111 = vector.broadcast %4 : vector<1x96xf32> to vector<2x96xf32>
    %112 = arith.addf %110, %111 : vector<2x96xf32>
    %113 = vector.extract_strided_slice %109 {offsets = [0, 0], sizes = [2, 32], strides = [1, 1]} : vector<2x96xf32> to vector<2x32xf32>
    %114 = vector.extract_strided_slice %112 {offsets = [0, 0], sizes = [2, 32], strides = [1, 1]} : vector<2x96xf32> to vector<2x32xf32>
    %115 = arith.addf %113, %114 : vector<2x32xf32>
    %116 = arith.negf %115 : vector<2x32xf32>
    %117 = math.exp %116 : vector<2x32xf32>
    %cst_35 = arith.constant 1.000000e+00 : f32
    %118 = vector.broadcast %cst_35 : f32 to vector<2x32xf32>
    %119 = arith.addf %118, %117 : vector<2x32xf32>
    %120 = arith.divf %118, %119 : vector<2x32xf32>
    %121 = vector.extract_strided_slice %109 {offsets = [0, 32], sizes = [2, 32], strides = [1, 1]} : vector<2x96xf32> to vector<2x32xf32>
    %122 = vector.extract_strided_slice %112 {offsets = [0, 32], sizes = [2, 32], strides = [1, 1]} : vector<2x96xf32> to vector<2x32xf32>
    %123 = arith.addf %121, %122 : vector<2x32xf32>
    %124 = arith.negf %123 : vector<2x32xf32>
    %125 = math.exp %124 : vector<2x32xf32>
    %cst_36 = arith.constant 1.000000e+00 : f32
    %126 = vector.broadcast %cst_36 : f32 to vector<2x32xf32>
    %127 = arith.addf %126, %125 : vector<2x32xf32>
    %128 = arith.divf %126, %127 : vector<2x32xf32>
    %129 = vector.extract_strided_slice %109 {offsets = [0, 64], sizes = [2, 32], strides = [1, 1]} : vector<2x96xf32> to vector<2x32xf32>
    %130 = vector.extract_strided_slice %112 {offsets = [0, 64], sizes = [2, 32], strides = [1, 1]} : vector<2x96xf32> to vector<2x32xf32>
    %131 = arith.mulf %120, %130 : vector<2x32xf32>
    %132 = arith.addf %129, %131 : vector<2x32xf32>
    %133 = math.tanh %132 : vector<2x32xf32>
    %cst_37 = arith.constant 1.000000e+00 : f32
    %134 = vector.broadcast %cst_37 : f32 to vector<2x32xf32>
    %135 = arith.subf %134, %128 : vector<2x32xf32>
    %136 = arith.mulf %135, %133 : vector<2x32xf32>
    %137 = arith.mulf %128, %104 : vector<2x32xf32>
    %138 = arith.addf %136, %137 : vector<2x32xf32>
    %c4_38 = arith.constant 4 : index
    %c0_39 = arith.constant 0 : index
    %c0_40 = arith.constant 0 : index
    %139 = vector.load %arg4[%c4_38, %c0_39, %c0_40] : memref<8x2x32xf32, #tpu.memory_space<vmem>>, vector<1x2x32xf32>
    %140 = vector.shape_cast %139 : vector<1x2x32xf32> to vector<2x32xf32>
    %141 = vector.shape_cast %138 : vector<2x32xf32> to vector<1x2x32xf32>
    tpu.vector_store %arg4[%c4_38, %c0_39, %c0_40], %141 {strides = array<i32>} : memref<8x2x32xf32, #tpu.memory_space<vmem>>, vector<1x2x32xf32>,
    %c3 = arith.constant 3 : index
    %c0_41 = arith.constant 0 : index
    %c0_42 = arith.constant 0 : index
    %142 = vector.load %arg1[%c3, %c0_41, %c0_42] : memref<8x2x96xf32, #tpu.memory_space<vmem>>, vector<1x2x96xf32>
    %143 = vector.shape_cast %142 : vector<1x2x96xf32> to vector<2x96xf32>
    %cst_43 = arith.constant dense<0.000000e+00> : vector<2x96xf32>
    %144 = tpu.matmul %138, %3, %cst_43 {dimension_numbers = #tpu.dot_dimension_numbers<[1], [0], [0], [1], [0, 0, 1, 1], [], []>} : vector<2x32xf32>, vector<32x96xf32>, vector<2x96xf32> -> vector<2x96xf32>
    %145 = vector.broadcast %4 : vector<1x96xf32> to vector<2x96xf32>
    %146 = arith.addf %144, %145 : vector<2x96xf32>
    %147 = vector.extract_strided_slice %143 {offsets = [0, 0], sizes = [2, 32], strides = [1, 1]} : vector<2x96xf32> to vector<2x32xf32>
    %148 = vector.extract_strided_slice %146 {offsets = [0, 0], sizes = [2, 32], strides = [1, 1]} : vector<2x96xf32> to vector<2x32xf32>
    %149 = arith.addf %147, %148 : vector<2x32xf32>
    %150 = arith.negf %149 : vector<2x32xf32>
    %151 = math.exp %150 : vector<2x32xf32>
    %cst_44 = arith.constant 1.000000e+00 : f32
    %152 = vector.broadcast %cst_44 : f32 to vector<2x32xf32>
    %153 = arith.addf %152, %151 : vector<2x32xf32>
    %154 = arith.divf %152, %153 : vector<2x32xf32>
    %155 = vector.extract_strided_slice %143 {offsets = [0, 32], sizes = [2, 32], strides = [1, 1]} : vector<2x96xf32> to vector<2x32xf32>
    %156 = vector.extract_strided_slice %146 {offsets = [0, 32], sizes = [2, 32], strides = [1, 1]} : vector<2x96xf32> to vector<2x32xf32>
    %157 = arith.addf %155, %156 : vector<2x32xf32>
    %158 = arith.negf %157 : vector<2x32xf32>
    %159 = math.exp %158 : vector<2x32xf32>
    %cst_45 = arith.constant 1.000000e+00 : f32
    %160 = vector.broadcast %cst_45 : f32 to vector<2x32xf32>
    %161 = arith.addf %160, %159 : vector<2x32xf32>
    %162 = arith.divf %160, %161 : vector<2x32xf32>
    %163 = vector.extract_strided_slice %143 {offsets = [0, 64], sizes = [2, 32], strides = [1, 1]} : vector<2x96xf32> to vector<2x32xf32>
    %164 = vector.extract_strided_slice %146 {offsets = [0, 64], sizes = [2, 32], strides = [1, 1]} : vector<2x96xf32> to vector<2x32xf32>
    %165 = arith.mulf %154, %164 : vector<2x32xf32>
    %166 = arith.addf %163, %165 : vector<2x32xf32>
    %167 = math.tanh %166 : vector<2x32xf32>
    %cst_46 = arith.constant 1.000000e+00 : f32
    %168 = vector.broadcast %cst_46 : f32 to vector<2x32xf32>
    %169 = arith.subf %168, %162 : vector<2x32xf32>
    %170 = arith.mulf %169, %167 : vector<2x32xf32>
    %171 = arith.mulf %162, %138 : vector<2x32xf32>
    %172 = arith.addf %170, %171 : vector<2x32xf32>
    %c3_47 = arith.constant 3 : index
    %c0_48 = arith.constant 0 : index
    %c0_49 = arith.constant 0 : index
    %173 = vector.load %arg4[%c3_47, %c0_48, %c0_49] : memref<8x2x32xf32, #tpu.memory_space<vmem>>, vector<1x2x32xf32>
    %174 = vector.shape_cast %173 : vector<1x2x32xf32> to vector<2x32xf32>
    %175 = vector.shape_cast %172 : vector<2x32xf32> to vector<1x2x32xf32>
    tpu.vector_store %arg4[%c3_47, %c0_48, %c0_49], %175 {strides = array<i32>} : memref<8x2x32xf32, #tpu.memory_space<vmem>>, vector<1x2x32xf32>,
    %c2 = arith.constant 2 : index
    %c0_50 = arith.constant 0 : index
    %c0_51 = arith.constant 0 : index
    %176 = vector.load %arg1[%c2, %c0_50, %c0_51] : memref<8x2x96xf32, #tpu.memory_space<vmem>>, vector<1x2x96xf32>
    %177 = vector.shape_cast %176 : vector<1x2x96xf32> to vector<2x96xf32>
    %cst_52 = arith.constant dense<0.000000e+00> : vector<2x96xf32>
    %178 = tpu.matmul %172, %3, %cst_52 {dimension_numbers = #tpu.dot_dimension_numbers<[1], [0], [0], [1], [0, 0, 1, 1], [], []>} : vector<2x32xf32>, vector<32x96xf32>, vector<2x96xf32> -> vector<2x96xf32>
    %179 = vector.broadcast %4 : vector<1x96xf32> to vector<2x96xf32>
    %180 = arith.addf %178, %179 : vector<2x96xf32>
    %181 = vector.extract_strided_slice %177 {offsets = [0, 0], sizes = [2, 32], strides = [1, 1]} : vector<2x96xf32> to vector<2x32xf32>
    %182 = vector.extract_strided_slice %180 {offsets = [0, 0], sizes = [2, 32], strides = [1, 1]} : vector<2x96xf32> to vector<2x32xf32>
    %183 = arith.addf %181, %182 : vector<2x32xf32>
    %184 = arith.negf %183 : vector<2x32xf32>
    %185 = math.exp %184 : vector<2x32xf32>
    %cst_53 = arith.constant 1.000000e+00 : f32
    %186 = vector.broadcast %cst_53 : f32 to vector<2x32xf32>
    %187 = arith.addf %186, %185 : vector<2x32xf32>
    %188 = arith.divf %186, %187 : vector<2x32xf32>
    %189 = vector.extract_strided_slice %177 {offsets = [0, 32], sizes = [2, 32], strides = [1, 1]} : vector<2x96xf32> to vector<2x32xf32>
    %190 = vector.extract_strided_slice %180 {offsets = [0, 32], sizes = [2, 32], strides = [1, 1]} : vector<2x96xf32> to vector<2x32xf32>
    %191 = arith.addf %189, %190 : vector<2x32xf32>
    %192 = arith.negf %191 : vector<2x32xf32>
    %193 = math.exp %192 : vector<2x32xf32>
    %cst_54 = arith.constant 1.000000e+00 : f32
    %194 = vector.broadcast %cst_54 : f32 to vector<2x32xf32>
    %195 = arith.addf %194, %193 : vector<2x32xf32>
    %196 = arith.divf %194, %195 : vector<2x32xf32>
    %197 = vector.extract_strided_slice %177 {offsets = [0, 64], sizes = [2, 32], strides = [1, 1]} : vector<2x96xf32> to vector<2x32xf32>
    %198 = vector.extract_strided_slice %180 {offsets = [0, 64], sizes = [2, 32], strides = [1, 1]} : vector<2x96xf32> to vector<2x32xf32>
    %199 = arith.mulf %188, %198 : vector<2x32xf32>
    %200 = arith.addf %197, %199 : vector<2x32xf32>
    %201 = math.tanh %200 : vector<2x32xf32>
    %cst_55 = arith.constant 1.000000e+00 : f32
    %202 = vector.broadcast %cst_55 : f32 to vector<2x32xf32>
    %203 = arith.subf %202, %196 : vector<2x32xf32>
    %204 = arith.mulf %203, %201 : vector<2x32xf32>
    %205 = arith.mulf %196, %172 : vector<2x32xf32>
    %206 = arith.addf %204, %205 : vector<2x32xf32>
    %c2_56 = arith.constant 2 : index
    %c0_57 = arith.constant 0 : index
    %c0_58 = arith.constant 0 : index
    %207 = vector.load %arg4[%c2_56, %c0_57, %c0_58] : memref<8x2x32xf32, #tpu.memory_space<vmem>>, vector<1x2x32xf32>
    %208 = vector.shape_cast %207 : vector<1x2x32xf32> to vector<2x32xf32>
    %209 = vector.shape_cast %206 : vector<2x32xf32> to vector<1x2x32xf32>
    tpu.vector_store %arg4[%c2_56, %c0_57, %c0_58], %209 {strides = array<i32>} : memref<8x2x32xf32, #tpu.memory_space<vmem>>, vector<1x2x32xf32>,
    %c1 = arith.constant 1 : index
    %c0_59 = arith.constant 0 : index
    %c0_60 = arith.constant 0 : index
    %210 = vector.load %arg1[%c1, %c0_59, %c0_60] : memref<8x2x96xf32, #tpu.memory_space<vmem>>, vector<1x2x96xf32>
    %211 = vector.shape_cast %210 : vector<1x2x96xf32> to vector<2x96xf32>
    %cst_61 = arith.constant dense<0.000000e+00> : vector<2x96xf32>
    %212 = tpu.matmul %206, %3, %cst_61 {dimension_numbers = #tpu.dot_dimension_numbers<[1], [0], [0], [1], [0, 0, 1, 1], [], []>} : vector<2x32xf32>, vector<32x96xf32>, vector<2x96xf32> -> vector<2x96xf32>
    %213 = vector.broadcast %4 : vector<1x96xf32> to vector<2x96xf32>
    %214 = arith.addf %212, %213 : vector<2x96xf32>
    %215 = vector.extract_strided_slice %211 {offsets = [0, 0], sizes = [2, 32], strides = [1, 1]} : vector<2x96xf32> to vector<2x32xf32>
    %216 = vector.extract_strided_slice %214 {offsets = [0, 0], sizes = [2, 32], strides = [1, 1]} : vector<2x96xf32> to vector<2x32xf32>
    %217 = arith.addf %215, %216 : vector<2x32xf32>
    %218 = arith.negf %217 : vector<2x32xf32>
    %219 = math.exp %218 : vector<2x32xf32>
    %cst_62 = arith.constant 1.000000e+00 : f32
    %220 = vector.broadcast %cst_62 : f32 to vector<2x32xf32>
    %221 = arith.addf %220, %219 : vector<2x32xf32>
    %222 = arith.divf %220, %221 : vector<2x32xf32>
    %223 = vector.extract_strided_slice %211 {offsets = [0, 32], sizes = [2, 32], strides = [1, 1]} : vector<2x96xf32> to vector<2x32xf32>
    %224 = vector.extract_strided_slice %214 {offsets = [0, 32], sizes = [2, 32], strides = [1, 1]} : vector<2x96xf32> to vector<2x32xf32>
    %225 = arith.addf %223, %224 : vector<2x32xf32>
    %226 = arith.negf %225 : vector<2x32xf32>
    %227 = math.exp %226 : vector<2x32xf32>
    %cst_63 = arith.constant 1.000000e+00 : f32
    %228 = vector.broadcast %cst_63 : f32 to vector<2x32xf32>
    %229 = arith.addf %228, %227 : vector<2x32xf32>
    %230 = arith.divf %228, %229 : vector<2x32xf32>
    %231 = vector.extract_strided_slice %211 {offsets = [0, 64], sizes = [2, 32], strides = [1, 1]} : vector<2x96xf32> to vector<2x32xf32>
    %232 = vector.extract_strided_slice %214 {offsets = [0, 64], sizes = [2, 32], strides = [1, 1]} : vector<2x96xf32> to vector<2x32xf32>
    %233 = arith.mulf %222, %232 : vector<2x32xf32>
    %234 = arith.addf %231, %233 : vector<2x32xf32>
    %235 = math.tanh %234 : vector<2x32xf32>
    %cst_64 = arith.constant 1.000000e+00 : f32
    %236 = vector.broadcast %cst_64 : f32 to vector<2x32xf32>
    %237 = arith.subf %236, %230 : vector<2x32xf32>
    %238 = arith.mulf %237, %235 : vector<2x32xf32>
    %239 = arith.mulf %230, %206 : vector<2x32xf32>
    %240 = arith.addf %238, %239 : vector<2x32xf32>
    %c1_65 = arith.constant 1 : index
    %c0_66 = arith.constant 0 : index
    %c0_67 = arith.constant 0 : index
    %241 = vector.load %arg4[%c1_65, %c0_66, %c0_67] : memref<8x2x32xf32, #tpu.memory_space<vmem>>, vector<1x2x32xf32>
    %242 = vector.shape_cast %241 : vector<1x2x32xf32> to vector<2x32xf32>
    %243 = vector.shape_cast %240 : vector<2x32xf32> to vector<1x2x32xf32>
    tpu.vector_store %arg4[%c1_65, %c0_66, %c0_67], %243 {strides = array<i32>} : memref<8x2x32xf32, #tpu.memory_space<vmem>>, vector<1x2x32xf32>,
    %c0_68 = arith.constant 0 : index
    %c0_69 = arith.constant 0 : index
    %c0_70 = arith.constant 0 : index
    %244 = vector.load %arg1[%c0_68, %c0_69, %c0_70] : memref<8x2x96xf32, #tpu.memory_space<vmem>>, vector<1x2x96xf32>
    %245 = vector.shape_cast %244 : vector<1x2x96xf32> to vector<2x96xf32>
    %cst_71 = arith.constant dense<0.000000e+00> : vector<2x96xf32>
    %246 = tpu.matmul %240, %3, %cst_71 {dimension_numbers = #tpu.dot_dimension_numbers<[1], [0], [0], [1], [0, 0, 1, 1], [], []>} : vector<2x32xf32>, vector<32x96xf32>, vector<2x96xf32> -> vector<2x96xf32>
    %247 = vector.broadcast %4 : vector<1x96xf32> to vector<2x96xf32>
    %248 = arith.addf %246, %247 : vector<2x96xf32>
    %249 = vector.extract_strided_slice %245 {offsets = [0, 0], sizes = [2, 32], strides = [1, 1]} : vector<2x96xf32> to vector<2x32xf32>
    %250 = vector.extract_strided_slice %248 {offsets = [0, 0], sizes = [2, 32], strides = [1, 1]} : vector<2x96xf32> to vector<2x32xf32>
    %251 = arith.addf %249, %250 : vector<2x32xf32>
    %252 = arith.negf %251 : vector<2x32xf32>
    %253 = math.exp %252 : vector<2x32xf32>
    %cst_72 = arith.constant 1.000000e+00 : f32
    %254 = vector.broadcast %cst_72 : f32 to vector<2x32xf32>
    %255 = arith.addf %254, %253 : vector<2x32xf32>
    %256 = arith.divf %254, %255 : vector<2x32xf32>
    %257 = vector.extract_strided_slice %245 {offsets = [0, 32], sizes = [2, 32], strides = [1, 1]} : vector<2x96xf32> to vector<2x32xf32>
    %258 = vector.extract_strided_slice %248 {offsets = [0, 32], sizes = [2, 32], strides = [1, 1]} : vector<2x96xf32> to vector<2x32xf32>
    %259 = arith.addf %257, %258 : vector<2x32xf32>
    %260 = arith.negf %259 : vector<2x32xf32>
    %261 = math.exp %260 : vector<2x32xf32>
    %cst_73 = arith.constant 1.000000e+00 : f32
    %262 = vector.broadcast %cst_73 : f32 to vector<2x32xf32>
    %263 = arith.addf %262, %261 : vector<2x32xf32>
    %264 = arith.divf %262, %263 : vector<2x32xf32>
    %265 = vector.extract_strided_slice %245 {offsets = [0, 64], sizes = [2, 32], strides = [1, 1]} : vector<2x96xf32> to vector<2x32xf32>
    %266 = vector.extract_strided_slice %248 {offsets = [0, 64], sizes = [2, 32], strides = [1, 1]} : vector<2x96xf32> to vector<2x32xf32>
    %267 = arith.mulf %256, %266 : vector<2x32xf32>
    %268 = arith.addf %265, %267 : vector<2x32xf32>
    %269 = math.tanh %268 : vector<2x32xf32>
    %cst_74 = arith.constant 1.000000e+00 : f32
    %270 = vector.broadcast %cst_74 : f32 to vector<2x32xf32>
    %271 = arith.subf %270, %264 : vector<2x32xf32>
    %272 = arith.mulf %271, %269 : vector<2x32xf32>
    %273 = arith.mulf %264, %240 : vector<2x32xf32>
    %274 = arith.addf %272, %273 : vector<2x32xf32>
    %c0_75 = arith.constant 0 : index
    %c0_76 = arith.constant 0 : index
    %c0_77 = arith.constant 0 : index
    %275 = vector.load %arg4[%c0_75, %c0_76, %c0_77] : memref<8x2x32xf32, #tpu.memory_space<vmem>>, vector<1x2x32xf32>
    %276 = vector.shape_cast %275 : vector<1x2x32xf32> to vector<2x32xf32>
    %277 = vector.shape_cast %274 : vector<2x32xf32> to vector<1x2x32xf32>
    tpu.vector_store %arg4[%c0_75, %c0_76, %c0_77], %277 {strides = array<i32>} : memref<8x2x32xf32, #tpu.memory_space<vmem>>, vector<1x2x32xf32>,
    %c0_78 = arith.constant 0 : index
    %c0_79 = arith.constant 0 : index
    %278 = vector.load %arg5[%c0_78, %c0_79] : memref<2x32xf32, #tpu.memory_space<vmem>>, vector<2x32xf32>
    tpu.vector_store %arg5[%c0_78, %c0_79], %274 {strides = array<i32>} : memref<2x32xf32, #tpu.memory_space<vmem>>, vector<2x32xf32>,
    return
  }
  func.func @transform_0(%arg0: i32) -> (i32, i32, i32) {
    %c0_i32 = arith.constant 0 : i32
    %0 = arith.subi %c0_i32, %arg0 : i32
    %c0_i32_0 = arith.constant 0 : i32
    %c0_i32_1 = arith.constant 0 : i32
    %c0_i32_2 = arith.constant 0 : i32
    return %0, %c0_i32_0, %c0_i32_1 : i32, i32, i32
  }
  func.func @transform_2(%arg0: i32) -> (i32, i32) {
    %c0_i32 = arith.constant 0 : i32
    %c0_i32_0 = arith.constant 0 : i32
    %c0_i32_1 = arith.constant 0 : i32
    return %c0_i32, %c0_i32_0 : i32, i32
  }
  func.func @transform_3(%arg0: i32) -> (i32, i32, i32) {
    %c0_i32 = arith.constant 0 : i32
    %0 = arith.subi %c0_i32, %arg0 : i32
    %c0_i32_0 = arith.constant 0 : i32
    %c0_i32_1 = arith.constant 0 : i32
    %c0_i32_2 = arith.constant 0 : i32
    return %0, %c0_i32_0, %c0_i32_1 : i32, i32, i32
  }
}

module attributes {stable_mosaic.version = 11 : i64} {
  func.func @kernel(%arg0: i32, %arg1: memref<16x32xf32, #tpu.memory_space<vmem>>, %arg2: memref<16x32xf32, #tpu.memory_space<vmem>>, %arg3: memref<2x32x96xf32, #tpu.memory_space<vmem>>, %arg4: memref<1x96xf32, #tpu.memory_space<vmem>>, %arg5: memref<16x96xf32, #tpu.memory_space<vmem>>) attributes {dimension_semantics = [#tpu.dimension_semantics<parallel>], iteration_bounds = array<i64: 1>, scalar_prefetch = 0 : i64, scratch_operands = 0 : i64, tpu.core_type = #tpu.core_type<tc>, window_params = [{transform_indices = @transform_0, window_bounds = array<i64: 16, 32>}, {transform_indices = @transform_1, window_bounds = array<i64: 16, 32>}, {pipeline_mode = #tpu.pipeline_mode<synchronous>, transform_indices = @transform_2, window_bounds = array<i64: 2, 32, 96>}, {pipeline_mode = #tpu.pipeline_mode<synchronous>, transform_indices = @transform_3, window_bounds = array<i64: 1, 96>}, {transform_indices = @transform_4, window_bounds = array<i64: 16, 96>}]} {
    %c0 = arith.constant 0 : index
    %c0_0 = arith.constant 0 : index
    %0 = vector.load %arg1[%c0, %c0_0] : memref<16x32xf32, #tpu.memory_space<vmem>>, vector<16x32xf32>
    %c0_1 = arith.constant 0 : index
    %c0_2 = arith.constant 0 : index
    %c0_3 = arith.constant 0 : index
    %1 = vector.load %arg3[%c0_1, %c0_2, %c0_3] : memref<2x32x96xf32, #tpu.memory_space<vmem>>, vector<1x32x96xf32>
    %2 = vector.shape_cast %1 : vector<1x32x96xf32> to vector<32x96xf32>
    %cst = arith.constant dense<0.000000e+00> : vector<16x96xf32>
    %3 = tpu.matmul %0, %2, %cst {dimension_numbers = #tpu.dot_dimension_numbers<[1], [0], [0], [1], [0, 0, 1, 1], [], []>} : vector<16x32xf32>, vector<32x96xf32>, vector<16x96xf32> -> vector<16x96xf32>
    %c0_4 = arith.constant 0 : index
    %c0_5 = arith.constant 0 : index
    %4 = vector.load %arg2[%c0_4, %c0_5] : memref<16x32xf32, #tpu.memory_space<vmem>>, vector<16x32xf32>
    %c1 = arith.constant 1 : index
    %c0_6 = arith.constant 0 : index
    %c0_7 = arith.constant 0 : index
    %5 = vector.load %arg3[%c1, %c0_6, %c0_7] : memref<2x32x96xf32, #tpu.memory_space<vmem>>, vector<1x32x96xf32>
    %6 = vector.shape_cast %5 : vector<1x32x96xf32> to vector<32x96xf32>
    %cst_8 = arith.constant dense<0.000000e+00> : vector<16x96xf32>
    %7 = tpu.matmul %4, %6, %cst_8 {dimension_numbers = #tpu.dot_dimension_numbers<[1], [0], [0], [1], [0, 0, 1, 1], [], []>} : vector<16x32xf32>, vector<32x96xf32>, vector<16x96xf32> -> vector<16x96xf32>
    %8 = arith.addf %3, %7 : vector<16x96xf32>
    %c0_9 = arith.constant 0 : index
    %c0_10 = arith.constant 0 : index
    %9 = vector.load %arg4[%c0_9, %c0_10] : memref<1x96xf32, #tpu.memory_space<vmem>>, vector<1x96xf32>
    %10 = vector.broadcast %9 : vector<1x96xf32> to vector<16x96xf32>
    %11 = arith.addf %8, %10 : vector<16x96xf32>
    %c0_11 = arith.constant 0 : index
    %c0_12 = arith.constant 0 : index
    %12 = vector.load %arg5[%c0_11, %c0_12] : memref<16x96xf32, #tpu.memory_space<vmem>>, vector<16x96xf32>
    tpu.vector_store %arg5[%c0_11, %c0_12], %11 {strides = array<i32>} : memref<16x96xf32, #tpu.memory_space<vmem>>, vector<16x96xf32>,
    return
  }
  func.func @transform_0(%arg0: i32) -> (i32, i32) {
    %c0_i32 = arith.constant 0 : i32
    %c0_i32_0 = arith.constant 0 : i32
    return %arg0, %c0_i32 : i32, i32
  }
  func.func @transform_1(%arg0: i32) -> (i32, i32) {
    %c0_i32 = arith.constant 0 : i32
    %c0_i32_0 = arith.constant 0 : i32
    return %arg0, %c0_i32 : i32, i32
  }
  func.func @transform_2(%arg0: i32) -> (i32, i32, i32) {
    %c0_i32 = arith.constant 0 : i32
    %c0_i32_0 = arith.constant 0 : i32
    %c0_i32_1 = arith.constant 0 : i32
    %c0_i32_2 = arith.constant 0 : i32
    return %c0_i32, %c0_i32_0, %c0_i32_1 : i32, i32, i32
  }
  func.func @transform_3(%arg0: i32) -> (i32, i32) {
    %c0_i32 = arith.constant 0 : i32
    %c0_i32_0 = arith.constant 0 : i32
    %c0_i32_1 = arith.constant 0 : i32
    return %c0_i32, %c0_i32_0 : i32, i32
  }
  func.func @transform_4(%arg0: i32) -> (i32, i32) {
    %c0_i32 = arith.constant 0 : i32
    %c0_i32_0 = arith.constant 0 : i32
    return %arg0, %c0_i32 : i32, i32
  }
}

module attributes {stable_mosaic.version = 11 : i64} {
  func.func @_nsp_head_kernel(%arg0: i32, %arg1: memref<2x64xf32, #tpu.memory_space<vmem>>, %arg2: memref<1x64xf32, #tpu.memory_space<vmem>>, %arg3: memref<1x1xf32, #tpu.memory_space<smem>>, %arg4: memref<2x1xf32, #tpu.memory_space<vmem>>) attributes {dimension_semantics = [#tpu.dimension_semantics<parallel>], iteration_bounds = array<i64: 1>, scalar_prefetch = 0 : i64, scratch_operands = 0 : i64, tpu.core_type = #tpu.core_type<tc>, window_params = [{transform_indices = @transform_0, window_bounds = array<i64: 2, 64>}, {pipeline_mode = #tpu.pipeline_mode<synchronous>, transform_indices = @transform_1, window_bounds = array<i64: 1, 64>}, {transform_indices = @transform_2, window_bounds = array<i64: 1, 1>}, {transform_indices = @transform_3, window_bounds = array<i64: 2, 1>}]} {
    %c0 = arith.constant 0 : index
    %c0_0 = arith.constant 0 : index
    %0 = vector.load %arg1[%c0, %c0_0] : memref<2x64xf32, #tpu.memory_space<vmem>>, vector<2x64xf32>
    %c0_1 = arith.constant 0 : index
    %c0_2 = arith.constant 0 : index
    %1 = vector.load %arg2[%c0_1, %c0_2] : memref<1x64xf32, #tpu.memory_space<vmem>>, vector<1x64xf32>
    %2 = vector.broadcast %1 : vector<1x64xf32> to vector<2x64xf32>
    %3 = arith.mulf %0, %2 : vector<2x64xf32>
    %cst = arith.constant dense<0.000000e+00> : vector<2xf32>
    %4 = vector.multi_reduction <add>, %3, %cst [1] : vector<2x64xf32> to vector<2xf32>
    %5 = vector.shape_cast %4 : vector<2xf32> to vector<2x1xf32>
    %c0_3 = arith.constant 0 : index
    %c0_4 = arith.constant 0 : index
    %6 = memref.load %arg3[%c0_3, %c0_4] : memref<1x1xf32, #tpu.memory_space<smem>>
    %7 = vector.broadcast %6 : f32 to vector<2x1xf32>
    %8 = arith.addf %5, %7 : vector<2x1xf32>
    %c0_5 = arith.constant 0 : index
    %c0_6 = arith.constant 0 : index
    %9 = vector.load %arg4[%c0_5, %c0_6] : memref<2x1xf32, #tpu.memory_space<vmem>>, vector<2x1xf32>
    tpu.vector_store %arg4[%c0_5, %c0_6], %8 {strides = array<i32>} : memref<2x1xf32, #tpu.memory_space<vmem>>, vector<2x1xf32>,
    return
  }
  func.func @transform_0(%arg0: i32) -> (i32, i32) {
    %c0_i32 = arith.constant 0 : i32
    %c0_i32_0 = arith.constant 0 : i32
    return %arg0, %c0_i32 : i32, i32
  }
  func.func @transform_1(%arg0: i32) -> (i32, i32) {
    %c0_i32 = arith.constant 0 : i32
    %c0_i32_0 = arith.constant 0 : i32
    %c0_i32_1 = arith.constant 0 : i32
    return %c0_i32, %c0_i32_0 : i32, i32
  }
  func.func @transform_2(%arg0: i32) -> (i32, i32) {
    %c0_i32 = arith.constant 0 : i32
    %c0_i32_0 = arith.constant 0 : i32
    %c0_i32_1 = arith.constant 0 : i32
    return %c0_i32, %c0_i32_0 : i32, i32
  }
  func.func @transform_3(%arg0: i32) -> (i32, i32) {
    %c0_i32 = arith.constant 0 : i32
    %c0_i32_0 = arith.constant 0 : i32
    return %arg0, %c0_i32 : i32, i32
  }
}

</mosaic_0001>

<bundles_post_ra>
// kernel: nsp_gru_forward.17
= control target key start
LH: loop header
LB: loop body
LE: loop exit
PB: predicated region body
PF: predicated region fallthrough
CT: control target
= control target key end

     0   :  { %vm27_vm0 = vcmask 261120   ;;  %vm109_vm1 = vcmask 785408   ;;  %s185_s1 = inlined_call_operand.vmem [shape: f32[1,32,96], index: 1, kind: input, shape index: {}]   ;;  %s186_s0 = inlined_call_operand.vmem [shape: f32[16,32], index: 0, kind: input, shape index: {}]   ;;  %s187_s2 = inlined_call_operand.vmem [shape: f32[1,96], index: 2, kind: input, shape index: {}]   ;;  %s188_s3 = inlined_call_operand.vmem [shape: f32[16,96], index: 3, kind: output, shape index: {}]  }
   0x1   :  { %v19_v0 = vld [vmem:[%s185_s1 + $0x18] sm:$0xff]  ;;  %v18_v1 = vld [vmem:[%s185_s1 + $0x10] sm:$0xff]  ;;  %v14_v2 = vld [vmem:[%s186_s0] sm:$0xff] }
   0x2   :  { %125 = vmatprep.subr.mxu0 %v19_v0  ;;  %v17_v3 = vld [vmem:[%s185_s1 + $0x8] sm:$0xff]  ;;  %133 = vmatprep.mubr.msk.f32.mxu0 %vm27_vm0, %v14_v2  ;;  %v16_v4 = vld [vmem:[%s185_s1] sm:$0xff] }
   0x3   :  { %126 = vmatpush3.msra.mxu0 %v19_v0  ;;  %v15_v5 = vld [vmem:[%s186_s0 + $0x8] sm:$0xff]  ;;  %v116_v6 = vld [vmem:[%s187_s2] ss:$0 sm:$0xff] }
   0x4   :  { %127 = vmatprep.subr.mxu0 %v18_v1 }
   0x5   :  { %128 = vmatpush3.msra.mxu0 %v18_v1 }
   0x6   :  { %129 = vmatprep.subr.mxu0 %v17_v3 }
   0x7   :  { %130 = vmatpush3.msra.mxu0 %v17_v3 }
   0x8   :  { %131 = vmatprep.subr.mxu0 %v16_v4 }
   0x9   :  { %132 = vmatpush3.msra.mxu0 %v16_v4 }
   0xa   :  { %134 = vmatmul.mubr.msk.f32.vlgmr.msra.gmra.mxu0 %vm27_vm0, %v15_v5 }
  0xca   :  { %v135_v7 = vpop.f32.mrf.mxu0 }
  0xcb   :  { %v106_v8 = vadd.f32 %v135_v7, %v116_v6 }
  0xcc   :  { %v100_v9 = vpop.f32.mrf.mxu0 }
  0xcd   :  { %111 = vst.msk [vmem:[%s188_s3 + $0x8] sm:$0xff] %vm109_vm1, %v106_v8  ;;  %v101_v10 = vadd.f32 %v116_v6, %v100_v9 }
  0xcf   :  { %110 = vst.msk [vmem:[%s188_s3] sm:$0xff] %vm109_vm1, %v101_v10 }

// kernel: nsp_gru_forward.20
= control target key start
LH: loop header
LB: loop body
LE: loop exit
PB: predicated region body
PF: predicated region fallthrough
CT: control target
= control target key end

     0   :  { %vm52_vm0 = vcmask 254976   ;;  %v1232_v0 = vmov 0.0   ;;  %s1469_s0 = inlined_call_operand.vmem [shape: f32[8,2,96], index: 0, kind: input, shape index: {}]   ;;  %s1470_s1 = inlined_call_operand.vmem [shape: f32[32,96], index: 1, kind: input, shape index: {}]   ;;  %s1471_s2 = inlined_call_operand.vmem [shape: f32[1,96], index: 2, kind: input, shape index: {}]   ;;  %s1472_s3 = inlined_call_operand.vmem [shape: f32[8,2,32], index: 3, kind: output, shape index: {}]  }
   0x1   :  { %53 = vst.msk [vmem:[#allocation2] sm:$0x3] %vm52_vm0, %v1232_v0  ;;  %v1262_v1 = vld [vmem:[%s1470_s1] sm:$0xff]  ;;  %v1267_v2 = vld [vmem:[%s1470_s1 + $0x8] sm:$0xff]  ;;  %v1272_v3 = vld [vmem:[%s1470_s1 + $0x10] sm:$0xff] }
   0x2   :  { %v1277_v4 = vld [vmem:[%s1470_s1 + $0x18] sm:$0xff] }
   0x3   :  { %102 = vsyncadd [#allocation4], 512 }
   0x4   :  { %1230 = dma.done.wait [#allocation4], 512 }
   0x5   :  { %1231 = vsyncadd [#allocation4], 4294966784  ;;  %1089 = vmatprep.subr.mxu0 %v1232_v0  ;;  %1100 = vmatprep.subr.mxu1 %v1232_v0  ;;  %vm1233_vm1 = vmmov 0   ;;  %vm120_vm2 = vcmask 261120   ;;  %v1315_v6 = vld [vmem:[%s1471_s2] ss:$0 sm:$0xff] }
   0x6   :  { %1090 = vmatpush3.msra.mxu0 %v1277_v4  ;;  %1097 = vmatprep.mubr.msk.f32.mxu0 %vm1233_vm1, %v1232_v0  ;;  %s1234_s21 = smov 64   ;;  %v1017_v10 = vld [vmem:[%s1469_s0 + $0xe] sm:$0x3]  ;;  %s1235_s2 = smov 96   ;;  %v1022_v31 = vld [vmem:[%s1469_s0 + $0xc] sm:$0x3] }
   0x7   :  { %1091 = vmatprep.subr.mxu0 %v1232_v0  ;;  %1101 = vmatpush3.msra.mxu1 %v1277_v4  ;;  %s1236_s24 = smov 32   ;;  %v1026_v51 = vld [vmem:[%s1469_s0 + $0xa] sm:$0x3] }
   0x8   :  { %1092 = vmatpush3.msra.mxu0 %v1272_v3  ;;  %1102 = vmatprep.subr.mxu1 %v1232_v0  ;;  %v111_v5 = vld [vmem:[#allocation2] sm:$0x3] }
   0x9   :  { %1093 = vmatprep.subr.mxu0 %v1232_v0  ;;  %1103 = vmatpush3.msra.mxu1 %v1272_v3 }
   0xa   :  { %1094 = vmatpush3.msra.mxu0 %v1267_v2  ;;  %1104 = vmatprep.subr.mxu1 %v1232_v0 }
   0xb   :  { %1095 = vmatprep.subr.mxu0 %v1232_v0  ;;  %1105 = vmatpush3.msra.mxu1 %v1267_v2 }
   0xc   :  { %1096 = vmatpush3.msra.mxu0 %v1262_v1  ;;  %1106 = vmatprep.subr.mxu1 %v1232_v0 }
   0xd   :  { %1098 = vmatmul.mubr.msk.f32.vlgmr.msra.gmra.mxu0 %vm120_vm2, %v111_v5  ;;  %1107 = vmatpush3.msra.mxu1 %v1262_v1 }
   0xe   :  { %1108 = vmatprep.mubr.msk.f32.mxu1 %vm1233_vm1, %v1232_v0  ;;  %1111 = vmatprep.subr.mxu0 %v1232_v0 }
   0xf   :  { %1112 = vmatpush3.msra.mxu0 %v1277_v4  ;;  %1119 = vmatprep.mubr.msk.f32.mxu0 %vm1233_vm1, %v1232_v0 }
  0x10   :  { %1113 = vmatprep.subr.mxu0 %v1232_v0  ;;  %1122 = vmatprep.subr.mxu1 %v1232_v0 }
  0x11   :  { %1114 = vmatpush3.msra.mxu0 %v1272_v3 }
  0x12   :  { %1115 = vmatprep.subr.mxu0 %v1232_v0 }
  0x13   :  { %1116 = vmatpush3.msra.mxu0 %v1267_v2 }
  0x14   :  { %1117 = vmatprep.subr.mxu0 %v1232_v0 }
  0x15   :  { %1118 = vmatpush3.msra.mxu0 %v1262_v1 }
  0x16   :  { %1133 = vmatprep.subr.mxu0 %v1232_v0 }
  0xcd   :  { %v190_v7 = vpop.f32.mrf.mxu0 }
  0xce   :  { %v191_v8 = vadd.f32 %v1315_v6, %v190_v7 }
  0xcf   :  { %v1099_v9 = vpop.f32.mrf.mxu0 }
  0xd0   :  { %202 = vrot.lane.b32.xlu0 %v191_v8, %s1234_s21  ;;  %v194_v11 = vadd.f32 %v1017_v10, %v191_v8 }
  0xd2   :  { %v1020_v12 = vmul.f32 -1.442695, %v194_v11 }
  0xd4   :  { %1182 = vpow2.f32 %v1020_v12 }
  0xe1   :  { %v1183_v13 = vpop.eup %1182 }
  0xe2   :  { %v198_v14 = vadd.f32 1.0, %v1183_v13  ;;  %v1030_v13 = vld [vmem:[%s1469_s0 + $0x8] sm:$0x3] }
  0xe4   :  { %1184 = vrcp.f32 %v198_v14 }
  0xf1   :  { %v1185_v15 = vpop.eup %1184 }
  0xf2   :  { %v212_v22 = vsub.f32 1.0, %v1185_v15 }
 0x142   :  { %v203_v16 = vpop.permute.xlu0 %202 }
 0x143   :  { %v205_v17 = vmul.f32 %v1185_v15, %v203_v16 }
 0x145   :  { %207 = vrot.lane.b32.xlu0 %v205_v17, %s1234_s21 }
 0x1b7   :  { %v208_v18 = vpop.permute.xlu0 %207 }
 0x1b8   :  { %v210_v19 = vadd.f32 %v1017_v10, %v208_v18 }
 0x1ba   :  { %1186 = vtanh.f32 %v210_v19 }
 0x1c7   :  { %v1187_v20 = vpop.eup %1186 }
 0x1c8   :  { %214 = vrot.lane.b32.xlu1 %v1187_v20, %s1235_s2 }
 0x1cc   :  { %218 = vrot.lane.b32.xlu1 %v111_v5, %s1236_s24 }
 0x23a   :  { %v215_v21 = vpop.permute.xlu1 %214 }
 0x23b   :  { %v217_v24 = vmul.f32 %v215_v21, %v212_v22 }
 0x23e   :  { %v219_v23 = vpop.permute.xlu1 %218 }
 0x23f   :  { %v221_v25 = vmul.f32 %v1185_v15, %v219_v23 }
 0x241   :  { %v222_v26 = vadd.f32 %v221_v25, %v217_v24 }
 0x243   :  { %224 = vrot.lane.b32.xlu0 %v222_v26, %s1235_s2 }
 0x2b5   :  { %v225_v27 = vpop.permute.xlu0 %224 }
 0x2b6   :  { %1021 = vst.msk [vmem:[%s1472_s3 + $0xe] sm:$0x3] %vm52_vm0, %v225_v27  ;;  %1109 = vmatmul.mubr.msk.f32.vlgmr.msra.gmra.mxu1 %vm120_vm2, %v225_v27 }
 0x2b7   :  { %1123 = vmatpush3.msra.mxu1 %v1277_v4  ;;  %1130 = vmatprep.mubr.msk.f32.mxu1 %vm1233_vm1, %v1232_v0 }
 0x2b8   :  { %1124 = vmatprep.subr.mxu1 %v1232_v0 }
 0x2b9   :  { %1125 = vmatpush3.msra.mxu1 %v1272_v3 }
 0x2ba   :  { %1126 = vmatprep.subr.mxu1 %v1232_v0 }
 0x2bb   :  { %1127 = vmatpush3.msra.mxu1 %v1267_v2 }
 0x2bc   :  { %1128 = vmatprep.subr.mxu1 %v1232_v0 }
 0x2bd   :  { %1129 = vmatpush3.msra.mxu1 %v1262_v1 }
 0x2be   :  { %1144 = vmatprep.subr.mxu1 %v1232_v0 }
 0x376   :  { %v300_v28 = vpop.f32.mrf.mxu1 }
 0x377   :  { %v301_v29 = vadd.f32 %v1315_v6, %v300_v28 }
 0x378   :  { %v1110_v30 = vpop.f32.mrf.mxu1 }
 0x379   :  { %312 = vrot.lane.b32.xlu1 %v301_v29, %s1234_s21  ;;  %v304_v32 = vadd.f32 %v1022_v31, %v301_v29 }
 0x37b   :  { %v1024_v33 = vmul.f32 -1.442695, %v304_v32 }
 0x37d   :  { %1188 = vpow2.f32 %v1024_v33  ;;  %v1034_v33 = vld [vmem:[%s1469_s0 + $0x6] sm:$0x3] }
 0x38a   :  { %v1189_v34 = vpop.eup %1188 }
 0x38b   :  { %v308_v35 = vadd.f32 1.0, %v1189_v34 }
 0x38d   :  { %1190 = vrcp.f32 %v308_v35 }
 0x39a   :  { %v1191_v36 = vpop.eup %1190 }
 0x39b   :  { %v322_v42 = vsub.f32 1.0, %v1191_v36  ;;  %v328_v44 = vmul.f32 %v1191_v36, %v222_v26 }
 0x3eb   :  { %v313_v37 = vpop.permute.xlu1 %312 }
 0x3ec   :  { %v315_v38 = vmul.f32 %v1191_v36, %v313_v37 }
 0x3ee   :  { %317 = vrot.lane.b32.xlu0 %v315_v38, %s1234_s21 }
 0x460   :  { %v318_v39 = vpop.permute.xlu0 %317 }
 0x461   :  { %v320_v40 = vadd.f32 %v1022_v31, %v318_v39 }
 0x463   :  { %1192 = vtanh.f32 %v320_v40 }
 0x470   :  { %v1193_v41 = vpop.eup %1192 }
 0x471   :  { %324 = vrot.lane.b32.xlu1 %v1193_v41, %s1235_s2 }
 0x4e3   :  { %v325_v43 = vpop.permute.xlu1 %324 }
 0x4e4   :  { %v327_v45 = vmul.f32 %v325_v43, %v322_v42 }
 0x4e6   :  { %v329_v46 = vadd.f32 %v328_v44, %v327_v45 }
 0x4e8   :  { %331 = vrot.lane.b32.xlu0 %v329_v46, %s1235_s2 }
 0x55a   :  { %v332_v47 = vpop.permute.xlu0 %331 }
 0x55b   :  { %1025 = vst.msk [vmem:[%s1472_s3 + $0xc] sm:$0x3] %vm52_vm0, %v332_v47  ;;  %1120 = vmatmul.mubr.msk.f32.vlgmr.msra.gmra.mxu0 %vm120_vm2, %v332_v47 }
 0x55c   :  { %1134 = vmatpush3.msra.mxu0 %v1277_v4  ;;  %1141 = vmatprep.mubr.msk.f32.mxu0 %vm1233_vm1, %v1232_v0 }
 0x55d   :  { %1135 = vmatprep.subr.mxu0 %v1232_v0 }
 0x55e   :  { %1136 = vmatpush3.msra.mxu0 %v1272_v3 }
 0x55f   :  { %1137 = vmatprep.subr.mxu0 %v1232_v0 }
 0x560   :  { %1138 = vmatpush3.msra.mxu0 %v1267_v2 }
 0x561   :  { %1139 = vmatprep.subr.mxu0 %v1232_v0 }
 0x562   :  { %1140 = vmatpush3.msra.mxu0 %v1262_v1 }
 0x563   :  { %1155 = vmatprep.subr.mxu0 %v1232_v0 }
 0x61b   :  { %v406_v48 = vpop.f32.mrf.mxu0 }
 0x61c   :  { %v407_v49 = vadd.f32 %v1315_v6, %v406_v48 }
 0x61d   :  { %v1121_v50 = vpop.f32.mrf.mxu0 }
 0x61e   :  { %418 = vrot.lane.b32.xlu1 %v407_v49, %s1234_s21  ;;  %v410_v52 = vadd.f32 %v1026_v51, %v407_v49 }
 0x620   :  { %v1028_v53 = vmul.f32 -1.442695, %v410_v52 }
 0x622   :  { %1194 = vpow2.f32 %v1028_v53 }
 0x62f   :  { %v1195_v54 = vpop.eup %1194 }
 0x630   :  { %v414_v55 = vadd.f32 1.0, %v1195_v54 }
 0x632   :  { %1196 = vrcp.f32 %v414_v55 }
 0x63f   :  { %v1197_v56 = vpop.eup %1196 }
 0x640   :  { %v428_v62 = vsub.f32 1.0, %v1197_v56  ;;  %v434_v5 = vmul.f32 %v1197_v56, %v329_v46 }
 0x690   :  { %v419_v57 = vpop.permute.xlu1 %418 }
 0x691   :  { %v421_v58 = vmul.f32 %v1197_v56, %v419_v57 }
 0x693   :  { %423 = vrot.lane.b32.xlu0 %v421_v58, %s1234_s21 }
 0x705   :  { %v424_v59 = vpop.permute.xlu0 %423 }
 0x706   :  { %v426_v60 = vadd.f32 %v1026_v51, %v424_v59 }
 0x708   :  { %1198 = vtanh.f32 %v426_v60 }
 0x715   :  { %v1199_v61 = vpop.eup %1198 }
 0x716   :  { %430 = vrot.lane.b32.xlu1 %v1199_v61, %s1235_s2 }
 0x788   :  { %v431_v63 = vpop.permute.xlu1 %430 }
 0x789   :  { %v433_v7 = vmul.f32 %v431_v63, %v428_v62 }
 0x78b   :  { %v435_v8 = vadd.f32 %v434_v5, %v433_v7 }
 0x78d   :  { %437 = vrot.lane.b32.xlu0 %v435_v8, %s1235_s2 }
 0x7ff   :  { %v438_v9 = vpop.permute.xlu0 %437 }
 0x800   :  { %1029 = vst.msk [vmem:[%s1472_s3 + $0xa] sm:$0x3] %vm52_vm0, %v438_v9  ;;  %1131 = vmatmul.mubr.msk.f32.vlgmr.msra.gmra.mxu1 %vm120_vm2, %v438_v9 }
 0x801   :  { %1145 = vmatpush3.msra.mxu1 %v1277_v4  ;;  %1152 = vmatprep.mubr.msk.f32.mxu1 %vm1233_vm1, %v1232_v0 }
 0x802   :  { %1146 = vmatprep.subr.mxu1 %v1232_v0 }
 0x803   :  { %1147 = vmatpush3.msra.mxu1 %v1272_v3 }
 0x804   :  { %1148 = vmatprep.subr.mxu1 %v1232_v0 }
 0x805   :  { %1149 = vmatpush3.msra.mxu1 %v1267_v2 }
 0x806   :  { %1150 = vmatprep.subr.mxu1 %v1232_v0 }
 0x807   :  { %1151 = vmatpush3.msra.mxu1 %v1262_v1 }
 0x808   :  { %1166 = vmatprep.subr.mxu1 %v1232_v0 }
 0x8c0   :  { %v512_v10 = vpop.f32.mrf.mxu1 }
 0x8c1   :  { %v513_v11 = vadd.f32 %v1315_v6, %v512_v10  ;;  %v1042_v10 = vld [vmem:[%s1469_s0 + $0x2] sm:$0x3] }
 0x8c2   :  { %v1132_v12 = vpop.f32.mrf.mxu1 }
 0x8c3   :  { %524 = vrot.lane.b32.xlu1 %v513_v11, %s1234_s21  ;;  %v516_v14 = vadd.f32 %v1030_v13, %v513_v11 }
 0x8c5   :  { %v1032_v15 = vmul.f32 -1.442695, %v516_v14 }
 0x8c7   :  { %1200 = vpow2.f32 %v1032_v15 }
 0x8d4   :  { %v1201_v16 = vpop.eup %1200 }
 0x8d5   :  { %v520_v17 = vadd.f32 1.0, %v1201_v16 }
 0x8d7   :  { %1202 = vrcp.f32 %v520_v17 }
 0x8e4   :  { %v1203_v18 = vpop.eup %1202 }
 0x8e5   :  { %v534_v24 = vsub.f32 1.0, %v1203_v18  ;;  %v540_v26 = vmul.f32 %v1203_v18, %v435_v8 }
 0x935   :  { %v525_v19 = vpop.permute.xlu1 %524 }
 0x936   :  { %v527_v20 = vmul.f32 %v1203_v18, %v525_v19 }
 0x938   :  { %529 = vrot.lane.b32.xlu0 %v527_v20, %s1234_s21 }
 0x9aa   :  { %v530_v21 = vpop.permute.xlu0 %529 }
 0x9ab   :  { %v532_v22 = vadd.f32 %v1030_v13, %v530_v21 }
 0x9ad   :  { %1204 = vtanh.f32 %v532_v22 }
 0x9ba   :  { %v1205_v23 = vpop.eup %1204 }
 0x9bb   :  { %536 = vrot.lane.b32.xlu1 %v1205_v23, %s1235_s2 }
 0xa2d   :  { %v537_v25 = vpop.permute.xlu1 %536 }
 0xa2e   :  { %v539_v27 = vmul.f32 %v537_v25, %v534_v24 }
 0xa30   :  { %v541_v28 = vadd.f32 %v540_v26, %v539_v27 }
 0xa32   :  { %543 = vrot.lane.b32.xlu0 %v541_v28, %s1235_s2 }
 0xaa4   :  { %v544_v29 = vpop.permute.xlu0 %543 }
 0xaa5   :  { %1033 = vst.msk [vmem:[%s1472_s3 + $0x8] sm:$0x3] %vm52_vm0, %v544_v29  ;;  %1142 = vmatmul.mubr.msk.f32.vlgmr.msra.gmra.mxu0 %vm120_vm2, %v544_v29 }
 0xaa6   :  { %1156 = vmatpush3.msra.mxu0 %v1277_v4  ;;  %1163 = vmatprep.mubr.msk.f32.mxu0 %vm1233_vm1, %v1232_v0 }
 0xaa7   :  { %1157 = vmatprep.subr.mxu0 %v1232_v0 }
 0xaa8   :  { %1158 = vmatpush3.msra.mxu0 %v1272_v3 }
 0xaa9   :  { %1159 = vmatprep.subr.mxu0 %v1232_v0 }
 0xaaa   :  { %1160 = vmatpush3.msra.mxu0 %v1267_v2 }
 0xaab   :  { %1161 = vmatprep.subr.mxu0 %v1232_v0 }
 0xaac   :  { %1162 = vmatpush3.msra.mxu0 %v1262_v1 }
 0xb65   :  { %v618_v30 = vpop.f32.mrf.mxu0 }
 0xb66   :  { %v619_v31 = vadd.f32 %v1315_v6, %v618_v30  ;;  %v866_v30 = vld [vmem:[%s1469_s0] sm:$0x3] }
 0xb67   :  { %v1143_v32 = vpop.f32.mrf.mxu0 }
 0xb68   :  { %630 = vrot.lane.b32.xlu1 %v619_v31, %s1234_s21  ;;  %v622_v34 = vadd.f32 %v1034_v33, %v619_v31 }
 0xb6a   :  { %v1036_v35 = vmul.f32 -1.442695, %v622_v34 }
 0xb6c   :  { %1206 = vpow2.f32 %v1036_v35 }
 0xb79   :  { %v1207_v36 = vpop.eup %1206 }
 0xb7a   :  { %v626_v37 = vadd.f32 1.0, %v1207_v36 }
 0xb7c   :  { %1208 = vrcp.f32 %v626_v37 }
 0xb89   :  { %v1209_v38 = vpop.eup %1208 }
 0xb8a   :  { %v640_v44 = vsub.f32 1.0, %v1209_v38  ;;  %v646_v46 = vmul.f32 %v1209_v38, %v541_v28 }
 0xbda   :  { %v631_v39 = vpop.permute.xlu1 %630 }
 0xbdb   :  { %v633_v40 = vmul.f32 %v1209_v38, %v631_v39 }
 0xbdd   :  { %635 = vrot.lane.b32.xlu0 %v633_v40, %s1234_s21 }
 0xc4f   :  { %v636_v41 = vpop.permute.xlu0 %635 }
 0xc50   :  { %v638_v42 = vadd.f32 %v1034_v33, %v636_v41 }
 0xc52   :  { %1210 = vtanh.f32 %v638_v42 }
 0xc5f   :  { %v1211_v43 = vpop.eup %1210 }
 0xc60   :  { %642 = vrot.lane.b32.xlu1 %v1211_v43, %s1235_s2 }
 0xcd2   :  { %v643_v45 = vpop.permute.xlu1 %642 }
 0xcd3   :  { %v645_v47 = vmul.f32 %v643_v45, %v640_v44 }
 0xcd5   :  { %v647_v48 = vadd.f32 %v646_v46, %v645_v47 }
 0xcd7   :  { %649 = vrot.lane.b32.xlu0 %v647_v48, %s1235_s2 }
 0xd49   :  { %v650_v49 = vpop.permute.xlu0 %649 }
 0xd4a   :  { %1037 = vst.msk [vmem:[%s1472_s3 + $0x6] sm:$0x3] %vm52_vm0, %v650_v49  ;;  %1153 = vmatmul.mubr.msk.f32.vlgmr.msra.gmra.mxu1 %vm120_vm2, %v650_v49 }
 0xd4b   :  { %1167 = vmatpush3.msra.mxu1 %v1277_v4  ;;  %1174 = vmatprep.mubr.msk.f32.mxu1 %vm1233_vm1, %v1232_v0  ;;  %v1038_v4 = vld [vmem:[%s1469_s0 + $0x4] sm:$0x3] }
 0xd4c   :  { %1168 = vmatprep.subr.mxu1 %v1232_v0 }
 0xd4d   :  { %1169 = vmatpush3.msra.mxu1 %v1272_v3 }
 0xd4e   :  { %1170 = vmatprep.subr.mxu1 %v1232_v0 }
 0xd4f   :  { %1171 = vmatpush3.msra.mxu1 %v1267_v2 }
 0xd50   :  { %1172 = vmatprep.subr.mxu1 %v1232_v0 }
 0xd51   :  { %1173 = vmatpush3.msra.mxu1 %v1262_v1 }
 0xe0a   :  { %v724_v50 = vpop.f32.mrf.mxu1 }
 0xe0b   :  { %v725_v51 = vadd.f32 %v1315_v6, %v724_v50 }
 0xe0c   :  { %v1154_v52 = vpop.f32.mrf.mxu1 }
 0xe0d   :  { %736 = vrot.lane.b32.xlu1 %v725_v51, %s1234_s21  ;;  %v728_v53 = vadd.f32 %v1038_v4, %v725_v51 }
 0xe0f   :  { %v1040_v3 = vmul.f32 -1.442695, %v728_v53 }
 0xe11   :  { %1212 = vpow2.f32 %v1040_v3 }
 0xe1e   :  { %v1213_v54 = vpop.eup %1212 }
 0xe1f   :  { %v732_v55 = vadd.f32 1.0, %v1213_v54 }
 0xe21   :  { %1214 = vrcp.f32 %v732_v55 }
 0xe2e   :  { %v1215_v2 = vpop.eup %1214 }
 0xe2f   :  { %v746_v59 = vsub.f32 1.0, %v1215_v2  ;;  %v752_v61 = vmul.f32 %v1215_v2, %v647_v48 }
 0xe7f   :  { %v737_v0 = vpop.permute.xlu1 %736 }
 0xe80   :  { %v739_v56 = vmul.f32 %v1215_v2, %v737_v0 }
 0xe82   :  { %741 = vrot.lane.b32.xlu0 %v739_v56, %s1234_s21 }
 0xef4   :  { %v742_v1 = vpop.permute.xlu0 %741 }
 0xef5   :  { %v744_v57 = vadd.f32 %v1038_v4, %v742_v1 }
 0xef7   :  { %1216 = vtanh.f32 %v744_v57 }
 0xf04   :  { %v1217_v58 = vpop.eup %1216 }
 0xf05   :  { %748 = vrot.lane.b32.xlu1 %v1217_v58, %s1235_s2 }
 0xf77   :  { %v749_v60 = vpop.permute.xlu1 %748 }
 0xf78   :  { %v751_v62 = vmul.f32 %v749_v60, %v746_v59 }
 0xf7a   :  { %v753_v63 = vadd.f32 %v752_v61, %v751_v62 }
 0xf7c   :  { %755 = vrot.lane.b32.xlu0 %v753_v63, %s1235_s2 }
 0xfee   :  { %v756_v5 = vpop.permute.xlu0 %755 }
 0xfef   :  { %1041 = vst.msk [vmem:[%s1472_s3 + $0x4] sm:$0x3] %vm52_vm0, %v756_v5  ;;  %1164 = vmatmul.mubr.msk.f32.vlgmr.msra.gmra.mxu0 %vm120_vm2, %v756_v5 }
0x10af   :  { %v830_v7 = vpop.f32.mrf.mxu0 }
0x10b0   :  { %v831_v8 = vadd.f32 %v1315_v6, %v830_v7 }
0x10b1   :  { %v1165_v9 = vpop.f32.mrf.mxu0 }
0x10b2   :  { %842 = vrot.lane.b32.xlu1 %v831_v8, %s1234_s21  ;;  %v834_v11 = vadd.f32 %v1042_v10, %v831_v8 }
0x10b4   :  { %v1044_v12 = vmul.f32 -1.442695, %v834_v11 }
0x10b6   :  { %1218 = vpow2.f32 %v1044_v12 }
0x10c3   :  { %v1219_v13 = vpop.eup %1218 }
0x10c4   :  { %v838_v14 = vadd.f32 1.0, %v1219_v13 }
0x10c6   :  { %1220 = vrcp.f32 %v838_v14 }
0x10d3   :  { %v1221_v15 = vpop.eup %1220 }
0x10d4   :  { %v852_v21 = vsub.f32 1.0, %v1221_v15  ;;  %v858_v23 = vmul.f32 %v1221_v15, %v753_v63 }
0x1124   :  { %v843_v16 = vpop.permute.xlu1 %842 }
0x1125   :  { %v845_v17 = vmul.f32 %v1221_v15, %v843_v16 }
0x1127   :  { %847 = vrot.lane.b32.xlu0 %v845_v17, %s1234_s21 }
0x1199   :  { %v848_v18 = vpop.permute.xlu0 %847 }
0x119a   :  { %v850_v19 = vadd.f32 %v1042_v10, %v848_v18 }
0x119c   :  { %1222 = vtanh.f32 %v850_v19 }
0x11a9   :  { %v1223_v20 = vpop.eup %1222 }
0x11aa   :  { %854 = vrot.lane.b32.xlu1 %v1223_v20, %s1235_s2 }
0x121c   :  { %v855_v22 = vpop.permute.xlu1 %854 }
0x121d   :  { %v857_v24 = vmul.f32 %v855_v22, %v852_v21 }
0x121f   :  { %v859_v25 = vadd.f32 %v858_v23, %v857_v24 }
0x1221   :  { %861 = vrot.lane.b32.xlu0 %v859_v25, %s1235_s2 }
0x1293   :  { %v862_v26 = vpop.permute.xlu0 %861 }
0x1294   :  { %1045 = vst.msk [vmem:[%s1472_s3 + $0x2] sm:$0x3] %vm52_vm0, %v862_v26  ;;  %1175 = vmatmul.mubr.msk.f32.vlgmr.msra.gmra.mxu1 %vm120_vm2, %v862_v26 }
0x1354   :  { %v935_v27 = vpop.f32.mrf.mxu1 }
0x1355   :  { %v936_v28 = vadd.f32 %v1315_v6, %v935_v27 }
0x1356   :  { %v1176_v29 = vpop.f32.mrf.mxu1 }
0x1357   :  { %947 = vrot.lane.b32.xlu1 %v936_v28, %s1234_s21  ;;  %v939_v31 = vadd.f32 %v936_v28, %v866_v30 }
0x1359   :  { %v1047_v32 = vmul.f32 -1.442695, %v939_v31 }
0x135b   :  { %1224 = vpow2.f32 %v1047_v32 }
0x1368   :  { %v1225_v33 = vpop.eup %1224 }
0x1369   :  { %v943_v34 = vadd.f32 1.0, %v1225_v33 }
0x136b   :  { %1226 = vrcp.f32 %v943_v34 }
0x1378   :  { %v1227_v35 = vpop.eup %1226 }
0x1379   :  { %v957_v40 = vsub.f32 1.0, %v1227_v35  ;;  %v963_v42 = vmul.f32 %v1227_v35, %v859_v25 }
0x13c9   :  { %v948_v36 = vpop.permute.xlu1 %947 }
0x13ca   :  { %v950_v37 = vmul.f32 %v1227_v35, %v948_v36 }
0x13cc   :  { %952 = vrot.lane.b32.xlu0 %v950_v37, %s1234_s21 }
0x143e   :  { %v953_v38 = vpop.permute.xlu0 %952 }
0x143f   :  { %v955_v6 = vadd.f32 %v953_v38, %v866_v30 }
0x1441   :  { %1228 = vtanh.f32 %v955_v6 }
0x144e   :  { %v1229_v39 = vpop.eup %1228 }
0x144f   :  { %959 = vrot.lane.b32.xlu1 %v1229_v39, %s1235_s2 }
0x14c1   :  { %v960_v41 = vpop.permute.xlu1 %959 }
0x14c2   :  { %v962_v43 = vmul.f32 %v960_v41, %v957_v40 }
0x14c4   :  { %v964_v44 = vadd.f32 %v963_v42, %v962_v43 }
0x14c6   :  { %966 = vrot.lane.b32.xlu0 %v964_v44, %s1235_s2 }
0x1538   :  { %v967_v45 = vpop.permute.xlu0 %966 }
0x1539   :  { %969 = vst.msk [vmem:[%s1472_s3] sm:$0x3] %vm52_vm0, %v967_v45  ;;  %970 = vst.msk [vmem:[#allocation2] sm:$0x3] %vm52_vm0, %v967_v45 }
0x153a   :  { %989 = vsyncmov [#allocation4] }
0x153d   :  { %s990_s21 = vpop.sfrf %989 }
0x153e   :  { %p1048_p0 = scmp.ne.s32.totalorder %s990_s21, 0 }
0x1540   :  { %994 = shalt.err (%p1048_p0)  }

// kernel: nsp_gru_forward.23
= control target key start
LH: loop header
LB: loop body
LE: loop exit
PB: predicated region body
PF: predicated region fallthrough
CT: control target
= control target key end

     0   :  { %vm30_vm0 = vcmask 261120   ;;  %vm202_vm1 = vcmask 785408   ;;  %s322_s2 = inlined_call_operand.vmem [shape: f32[2,32,96], index: 2, kind: input, shape index: {}]   ;;  %s323_s1 = inlined_call_operand.vmem [shape: f32[16,32], index: 1, kind: input, shape index: {}]   ;;  %s324_s0 = inlined_call_operand.vmem [shape: f32[16,32], index: 0, kind: input, shape index: {}]   ;;  %s325_s3 = inlined_call_operand.vmem [shape: f32[1,96], index: 3, kind: input, shape index: {}]   ;;  %s326_s4 = inlined_call_operand.vmem [shape: f32[16,96], index: 4, kind: output, shape index: {}]  }
   0x1   :  { %v212_v0 = vld [vmem:[%s322_s2 + $0x38] sm:$0xff]  ;;  %v211_v2 = vld [vmem:[%s322_s2 + $0x30] sm:$0xff]  ;;  %v210_v4 = vld [vmem:[%s322_s2 + $0x28] sm:$0xff] }
   0x2   :  { %v22_v1 = vld [vmem:[%s322_s2 + $0x18] sm:$0xff]  ;;  %230 = vmatprep.subr.mxu0 %v212_v0  ;;  %v21_v3 = vld [vmem:[%s322_s2 + $0x10] sm:$0xff]  ;;  %v20_v5 = vld [vmem:[%s322_s2 + $0x8] sm:$0xff] }
   0x3   :  { %241 = vmatprep.subr.mxu1 %v22_v1  ;;  %231 = vmatpush3.msra.mxu0 %v212_v0  ;;  %v209_v6 = vld [vmem:[%s322_s2 + $0x20] sm:$0xff]  ;;  %v24_v10 = vld [vmem:[%s323_s1 + $0x8] sm:$0xff] }
   0x4   :  { %242 = vmatpush3.msra.mxu1 %v22_v1  ;;  %232 = vmatprep.subr.mxu0 %v211_v2  ;;  %v19_v7 = vld [vmem:[%s322_s2] sm:$0xff]  ;;  %v18_v11 = vld [vmem:[%s324_s0 + $0x8] sm:$0xff] }
   0x5   :  { %243 = vmatprep.subr.mxu1 %v21_v3  ;;  %233 = vmatpush3.msra.mxu0 %v211_v2  ;;  %v23_v8 = vld [vmem:[%s323_s1] sm:$0xff] }
   0x6   :  { %244 = vmatpush3.msra.mxu1 %v21_v3  ;;  %234 = vmatprep.subr.mxu0 %v210_v4  ;;  %v17_v9 = vld [vmem:[%s324_s0] sm:$0xff] }
   0x7   :  { %245 = vmatprep.subr.mxu1 %v20_v5  ;;  %235 = vmatpush3.msra.mxu0 %v210_v4  ;;  %v217_v14 = vld [vmem:[%s325_s3] ss:$0 sm:$0xff] }
   0x8   :  { %246 = vmatpush3.msra.mxu1 %v20_v5  ;;  %236 = vmatprep.subr.mxu0 %v209_v6 }
   0x9   :  { %247 = vmatprep.subr.mxu1 %v19_v7  ;;  %237 = vmatpush3.msra.mxu0 %v209_v6 }
   0xa   :  { %238 = vmatprep.mubr.msk.f32.mxu0 %vm30_vm0, %v23_v8  ;;  %248 = vmatpush3.msra.mxu1 %v19_v7 }
   0xb   :  { %249 = vmatprep.mubr.msk.f32.mxu1 %vm30_vm0, %v17_v9  ;;  %239 = vmatmul.mubr.msk.f32.vlgmr.msra.gmra.mxu0 %vm30_vm0, %v24_v10 }
   0xc   :  { %250 = vmatmul.mubr.msk.f32.vlgmr.msra.gmra.mxu1 %vm30_vm0, %v18_v11 }
  0xcb   :  { %v240_v12 = vpop.f32.mrf.mxu0 }
  0xcc   :  { %v251_v13 = vpop.f32.mrf.mxu1 }
  0xcd   :  { %v190_v15 = vadd.f32 %v251_v13, %v240_v12  ;;  %v103_v16 = vpop.f32.mrf.mxu0 }
  0xce   :  { %v184_v17 = vpop.f32.mrf.mxu1 }
  0xcf   :  { %v201_v18 = vadd.f32 %v217_v14, %v190_v15  ;;  %v185_v19 = vadd.f32 %v184_v17, %v103_v16 }
  0xd1   :  { %204 = vst.msk [vmem:[%s326_s4 + $0x8] sm:$0xff] %vm202_vm1, %v201_v18  ;;  %v200_v20 = vadd.f32 %v217_v14, %v185_v19 }
  0xd3   :  { %203 = vst.msk [vmem:[%s326_s4] sm:$0xff] %vm202_vm1, %v200_v20 }

// kernel: nsp_gru_forward.18
= control target key start
LH: loop header
LB: loop body
LE: loop exit
PB: predicated region body
PF: predicated region fallthrough
CT: control target
= control target key end

     0   :  { %vm16_vm0 = vcmask 254976   ;;  %v1168_v0 = vmov 0.0   ;;  %s1405_s0 = inlined_call_operand.vmem [shape: f32[8,2,96], index: 0, kind: input, shape index: {}]   ;;  %s1406_s1 = inlined_call_operand.vmem [shape: f32[32,96], index: 1, kind: input, shape index: {}]   ;;  %s1407_s2 = inlined_call_operand.vmem [shape: f32[1,96], index: 2, kind: input, shape index: {}]   ;;  %s1408_s3 = inlined_call_operand.vmem [shape: f32[8,2,32], index: 3, kind: output, shape index: {}]  }
   0x1   :  { %17 = vst.msk [vmem:[#allocation2] sm:$0x3] %vm16_vm0, %v1168_v0  ;;  %v1198_v1 = vld [vmem:[%s1406_s1] sm:$0xff]  ;;  %v1203_v2 = vld [vmem:[%s1406_s1 + $0x8] sm:$0xff]  ;;  %v1208_v3 = vld [vmem:[%s1406_s1 + $0x10] sm:$0xff] }
   0x2   :  { %v1213_v4 = vld [vmem:[%s1406_s1 + $0x18] sm:$0xff] }
   0x3   :  { %66 = vsyncadd [#allocation4], 512 }
   0x4   :  { %1166 = dma.done.wait [#allocation4], 512 }
   0x5   :  { %1167 = vsyncadd [#allocation4], 4294966784  ;;  %1025 = vmatprep.subr.mxu0 %v1168_v0  ;;  %1036 = vmatprep.subr.mxu1 %v1168_v0  ;;  %vm1169_vm1 = vmmov 0   ;;  %vm83_vm2 = vcmask 261120   ;;  %v1251_v6 = vld [vmem:[%s1407_s2] ss:$0 sm:$0xff] }
   0x6   :  { %1026 = vmatpush3.msra.mxu0 %v1213_v4  ;;  %1033 = vmatprep.mubr.msk.f32.mxu0 %vm1169_vm1, %v1168_v0  ;;  %s1170_s21 = smov 64   ;;  %v76_v10 = vld [vmem:[%s1405_s0] sm:$0x3]  ;;  %s1171_s2 = smov 96   ;;  %v956_v31 = vld [vmem:[%s1405_s0 + $0x2] sm:$0x3] }
   0x7   :  { %1027 = vmatprep.subr.mxu0 %v1168_v0  ;;  %1037 = vmatpush3.msra.mxu1 %v1213_v4  ;;  %s1172_s24 = smov 32   ;;  %v960_v51 = vld [vmem:[%s1405_s0 + $0x4] sm:$0x3] }
   0x8   :  { %1028 = vmatpush3.msra.mxu0 %v1208_v3  ;;  %1038 = vmatprep.subr.mxu1 %v1168_v0  ;;  %v75_v5 = vld [vmem:[#allocation2] sm:$0x3] }
   0x9   :  { %1029 = vmatprep.subr.mxu0 %v1168_v0  ;;  %1039 = vmatpush3.msra.mxu1 %v1208_v3 }
   0xa   :  { %1030 = vmatpush3.msra.mxu0 %v1203_v2  ;;  %1040 = vmatprep.subr.mxu1 %v1168_v0 }
   0xb   :  { %1031 = vmatprep.subr.mxu0 %v1168_v0  ;;  %1041 = vmatpush3.msra.mxu1 %v1203_v2 }
   0xc   :  { %1032 = vmatpush3.msra.mxu0 %v1198_v1  ;;  %1042 = vmatprep.subr.mxu1 %v1168_v0 }
   0xd   :  { %1034 = vmatmul.mubr.msk.f32.vlgmr.msra.gmra.mxu0 %vm83_vm2, %v75_v5  ;;  %1043 = vmatpush3.msra.mxu1 %v1198_v1 }
   0xe   :  { %1044 = vmatprep.mubr.msk.f32.mxu1 %vm1169_vm1, %v1168_v0  ;;  %1047 = vmatprep.subr.mxu0 %v1168_v0 }
   0xf   :  { %1048 = vmatpush3.msra.mxu0 %v1213_v4  ;;  %1055 = vmatprep.mubr.msk.f32.mxu0 %vm1169_vm1, %v1168_v0 }
  0x10   :  { %1049 = vmatprep.subr.mxu0 %v1168_v0  ;;  %1058 = vmatprep.subr.mxu1 %v1168_v0 }
  0x11   :  { %1050 = vmatpush3.msra.mxu0 %v1208_v3 }
  0x12   :  { %1051 = vmatprep.subr.mxu0 %v1168_v0 }
  0x13   :  { %1052 = vmatpush3.msra.mxu0 %v1203_v2 }
  0x14   :  { %1053 = vmatprep.subr.mxu0 %v1168_v0 }
  0x15   :  { %1054 = vmatpush3.msra.mxu0 %v1198_v1 }
  0x16   :  { %1069 = vmatprep.subr.mxu0 %v1168_v0 }
  0xcd   :  { %v153_v7 = vpop.f32.mrf.mxu0 }
  0xce   :  { %v154_v8 = vadd.f32 %v1251_v6, %v153_v7 }
  0xcf   :  { %v1035_v9 = vpop.f32.mrf.mxu0 }
  0xd0   :  { %165 = vrot.lane.b32.xlu0 %v154_v8, %s1170_s21  ;;  %v157_v11 = vadd.f32 %v154_v8, %v76_v10 }
  0xd2   :  { %v955_v12 = vmul.f32 -1.442695, %v157_v11 }
  0xd4   :  { %1118 = vpow2.f32 %v955_v12 }
  0xe1   :  { %v1119_v13 = vpop.eup %1118 }
  0xe2   :  { %v161_v14 = vadd.f32 1.0, %v1119_v13  ;;  %v964_v13 = vld [vmem:[%s1405_s0 + $0x6] sm:$0x3] }
  0xe4   :  { %1120 = vrcp.f32 %v161_v14 }
  0xf1   :  { %v1121_v15 = vpop.eup %1120 }
  0xf2   :  { %v175_v22 = vsub.f32 1.0, %v1121_v15 }
 0x142   :  { %v166_v16 = vpop.permute.xlu0 %165 }
 0x143   :  { %v168_v17 = vmul.f32 %v1121_v15, %v166_v16 }
 0x145   :  { %170 = vrot.lane.b32.xlu0 %v168_v17, %s1170_s21 }
 0x1b7   :  { %v171_v18 = vpop.permute.xlu0 %170 }
 0x1b8   :  { %v173_v19 = vadd.f32 %v171_v18, %v76_v10 }
 0x1ba   :  { %1122 = vtanh.f32 %v173_v19 }
 0x1c7   :  { %v1123_v20 = vpop.eup %1122 }
 0x1c8   :  { %177 = vrot.lane.b32.xlu1 %v1123_v20, %s1171_s2 }
 0x1cc   :  { %181 = vrot.lane.b32.xlu1 %v75_v5, %s1172_s24 }
 0x23a   :  { %v178_v21 = vpop.permute.xlu1 %177 }
 0x23b   :  { %v180_v24 = vmul.f32 %v178_v21, %v175_v22 }
 0x23e   :  { %v182_v23 = vpop.permute.xlu1 %181 }
 0x23f   :  { %v184_v25 = vmul.f32 %v1121_v15, %v182_v23 }
 0x241   :  { %v185_v26 = vadd.f32 %v184_v25, %v180_v24 }
 0x243   :  { %187 = vrot.lane.b32.xlu0 %v185_v26, %s1171_s2 }
 0x2b5   :  { %v188_v27 = vpop.permute.xlu0 %187 }
 0x2b6   :  { %191 = vst.msk [vmem:[%s1408_s3] sm:$0x3] %vm16_vm0, %v188_v27  ;;  %1045 = vmatmul.mubr.msk.f32.vlgmr.msra.gmra.mxu1 %vm83_vm2, %v188_v27 }
 0x2b7   :  { %1059 = vmatpush3.msra.mxu1 %v1213_v4  ;;  %1066 = vmatprep.mubr.msk.f32.mxu1 %vm1169_vm1, %v1168_v0 }
 0x2b8   :  { %1060 = vmatprep.subr.mxu1 %v1168_v0 }
 0x2b9   :  { %1061 = vmatpush3.msra.mxu1 %v1208_v3 }
 0x2ba   :  { %1062 = vmatprep.subr.mxu1 %v1168_v0 }
 0x2bb   :  { %1063 = vmatpush3.msra.mxu1 %v1203_v2 }
 0x2bc   :  { %1064 = vmatprep.subr.mxu1 %v1168_v0 }
 0x2bd   :  { %1065 = vmatpush3.msra.mxu1 %v1198_v1 }
 0x2be   :  { %1080 = vmatprep.subr.mxu1 %v1168_v0 }
 0x376   :  { %v262_v28 = vpop.f32.mrf.mxu1 }
 0x377   :  { %v263_v29 = vadd.f32 %v1251_v6, %v262_v28 }
 0x378   :  { %v1046_v30 = vpop.f32.mrf.mxu1 }
 0x379   :  { %274 = vrot.lane.b32.xlu1 %v263_v29, %s1170_s21  ;;  %v266_v32 = vadd.f32 %v956_v31, %v263_v29 }
 0x37b   :  { %v958_v33 = vmul.f32 -1.442695, %v266_v32 }
 0x37d   :  { %1124 = vpow2.f32 %v958_v33  ;;  %v968_v33 = vld [vmem:[%s1405_s0 + $0x8] sm:$0x3] }
 0x38a   :  { %v1125_v34 = vpop.eup %1124 }
 0x38b   :  { %v270_v35 = vadd.f32 1.0, %v1125_v34 }
 0x38d   :  { %1126 = vrcp.f32 %v270_v35 }
 0x39a   :  { %v1127_v36 = vpop.eup %1126 }
 0x39b   :  { %v284_v42 = vsub.f32 1.0, %v1127_v36  ;;  %v290_v44 = vmul.f32 %v1127_v36, %v185_v26 }
 0x3eb   :  { %v275_v37 = vpop.permute.xlu1 %274 }
 0x3ec   :  { %v277_v38 = vmul.f32 %v1127_v36, %v275_v37 }
 0x3ee   :  { %279 = vrot.lane.b32.xlu0 %v277_v38, %s1170_s21 }
 0x460   :  { %v280_v39 = vpop.permute.xlu0 %279 }
 0x461   :  { %v282_v40 = vadd.f32 %v956_v31, %v280_v39 }
 0x463   :  { %1128 = vtanh.f32 %v282_v40 }
 0x470   :  { %v1129_v41 = vpop.eup %1128 }
 0x471   :  { %286 = vrot.lane.b32.xlu1 %v1129_v41, %s1171_s2 }
 0x4e3   :  { %v287_v43 = vpop.permute.xlu1 %286 }
 0x4e4   :  { %v289_v45 = vmul.f32 %v287_v43, %v284_v42 }
 0x4e6   :  { %v291_v46 = vadd.f32 %v290_v44, %v289_v45 }
 0x4e8   :  { %293 = vrot.lane.b32.xlu0 %v291_v46, %s1171_s2 }
 0x55a   :  { %v294_v47 = vpop.permute.xlu0 %293 }
 0x55b   :  { %959 = vst.msk [vmem:[%s1408_s3 + $0x2] sm:$0x3] %vm16_vm0, %v294_v47  ;;  %1056 = vmatmul.mubr.msk.f32.vlgmr.msra.gmra.mxu0 %vm83_vm2, %v294_v47 }
 0x55c   :  { %1070 = vmatpush3.msra.mxu0 %v1213_v4  ;;  %1077 = vmatprep.mubr.msk.f32.mxu0 %vm1169_vm1, %v1168_v0 }
 0x55d   :  { %1071 = vmatprep.subr.mxu0 %v1168_v0 }
 0x55e   :  { %1072 = vmatpush3.msra.mxu0 %v1208_v3 }
 0x55f   :  { %1073 = vmatprep.subr.mxu0 %v1168_v0 }
 0x560   :  { %1074 = vmatpush3.msra.mxu0 %v1203_v2 }
 0x561   :  { %1075 = vmatprep.subr.mxu0 %v1168_v0 }
 0x562   :  { %1076 = vmatpush3.msra.mxu0 %v1198_v1 }
 0x563   :  { %1091 = vmatprep.subr.mxu0 %v1168_v0 }
 0x61b   :  { %v368_v48 = vpop.f32.mrf.mxu0 }
 0x61c   :  { %v369_v49 = vadd.f32 %v1251_v6, %v368_v48 }
 0x61d   :  { %v1057_v50 = vpop.f32.mrf.mxu0 }
 0x61e   :  { %380 = vrot.lane.b32.xlu1 %v369_v49, %s1170_s21  ;;  %v372_v52 = vadd.f32 %v960_v51, %v369_v49 }
 0x620   :  { %v962_v53 = vmul.f32 -1.442695, %v372_v52 }
 0x622   :  { %1130 = vpow2.f32 %v962_v53 }
 0x62f   :  { %v1131_v54 = vpop.eup %1130 }
 0x630   :  { %v376_v55 = vadd.f32 1.0, %v1131_v54 }
 0x632   :  { %1132 = vrcp.f32 %v376_v55 }
 0x63f   :  { %v1133_v56 = vpop.eup %1132 }
 0x640   :  { %v390_v62 = vsub.f32 1.0, %v1133_v56  ;;  %v396_v5 = vmul.f32 %v1133_v56, %v291_v46 }
 0x690   :  { %v381_v57 = vpop.permute.xlu1 %380 }
 0x691   :  { %v383_v58 = vmul.f32 %v1133_v56, %v381_v57 }
 0x693   :  { %385 = vrot.lane.b32.xlu0 %v383_v58, %s1170_s21 }
 0x705   :  { %v386_v59 = vpop.permute.xlu0 %385 }
 0x706   :  { %v388_v60 = vadd.f32 %v960_v51, %v386_v59 }
 0x708   :  { %1134 = vtanh.f32 %v388_v60 }
 0x715   :  { %v1135_v61 = vpop.eup %1134 }
 0x716   :  { %392 = vrot.lane.b32.xlu1 %v1135_v61, %s1171_s2 }
 0x788   :  { %v393_v63 = vpop.permute.xlu1 %392 }
 0x789   :  { %v395_v7 = vmul.f32 %v393_v63, %v390_v62 }
 0x78b   :  { %v397_v8 = vadd.f32 %v396_v5, %v395_v7 }
 0x78d   :  { %399 = vrot.lane.b32.xlu0 %v397_v8, %s1171_s2 }
 0x7ff   :  { %v400_v9 = vpop.permute.xlu0 %399 }
 0x800   :  { %963 = vst.msk [vmem:[%s1408_s3 + $0x4] sm:$0x3] %vm16_vm0, %v400_v9  ;;  %1067 = vmatmul.mubr.msk.f32.vlgmr.msra.gmra.mxu1 %vm83_vm2, %v400_v9 }
 0x801   :  { %1081 = vmatpush3.msra.mxu1 %v1213_v4  ;;  %1088 = vmatprep.mubr.msk.f32.mxu1 %vm1169_vm1, %v1168_v0 }
 0x802   :  { %1082 = vmatprep.subr.mxu1 %v1168_v0 }
 0x803   :  { %1083 = vmatpush3.msra.mxu1 %v1208_v3 }
 0x804   :  { %1084 = vmatprep.subr.mxu1 %v1168_v0 }
 0x805   :  { %1085 = vmatpush3.msra.mxu1 %v1203_v2 }
 0x806   :  { %1086 = vmatprep.subr.mxu1 %v1168_v0 }
 0x807   :  { %1087 = vmatpush3.msra.mxu1 %v1198_v1 }
 0x808   :  { %1102 = vmatprep.subr.mxu1 %v1168_v0 }
 0x8c0   :  { %v474_v10 = vpop.f32.mrf.mxu1 }
 0x8c1   :  { %v475_v11 = vadd.f32 %v1251_v6, %v474_v10  ;;  %v976_v10 = vld [vmem:[%s1405_s0 + $0xc] sm:$0x3] }
 0x8c2   :  { %v1068_v12 = vpop.f32.mrf.mxu1 }
 0x8c3   :  { %486 = vrot.lane.b32.xlu1 %v475_v11, %s1170_s21  ;;  %v478_v14 = vadd.f32 %v964_v13, %v475_v11 }
 0x8c5   :  { %v966_v15 = vmul.f32 -1.442695, %v478_v14 }
 0x8c7   :  { %1136 = vpow2.f32 %v966_v15 }
 0x8d4   :  { %v1137_v16 = vpop.eup %1136 }
 0x8d5   :  { %v482_v17 = vadd.f32 1.0, %v1137_v16 }
 0x8d7   :  { %1138 = vrcp.f32 %v482_v17 }
 0x8e4   :  { %v1139_v18 = vpop.eup %1138 }
 0x8e5   :  { %v496_v24 = vsub.f32 1.0, %v1139_v18  ;;  %v502_v26 = vmul.f32 %v1139_v18, %v397_v8 }
 0x935   :  { %v487_v19 = vpop.permute.xlu1 %486 }
 0x936   :  { %v489_v20 = vmul.f32 %v1139_v18, %v487_v19 }
 0x938   :  { %491 = vrot.lane.b32.xlu0 %v489_v20, %s1170_s21 }
 0x9aa   :  { %v492_v21 = vpop.permute.xlu0 %491 }
 0x9ab   :  { %v494_v22 = vadd.f32 %v964_v13, %v492_v21 }
 0x9ad   :  { %1140 = vtanh.f32 %v494_v22 }
 0x9ba   :  { %v1141_v23 = vpop.eup %1140 }
 0x9bb   :  { %498 = vrot.lane.b32.xlu1 %v1141_v23, %s1171_s2 }
 0xa2d   :  { %v499_v25 = vpop.permute.xlu1 %498 }
 0xa2e   :  { %v501_v27 = vmul.f32 %v499_v25, %v496_v24 }
 0xa30   :  { %v503_v28 = vadd.f32 %v502_v26, %v501_v27 }
 0xa32   :  { %505 = vrot.lane.b32.xlu0 %v503_v28, %s1171_s2 }
 0xaa4   :  { %v506_v29 = vpop.permute.xlu0 %505 }
 0xaa5   :  { %967 = vst.msk [vmem:[%s1408_s3 + $0x6] sm:$0x3] %vm16_vm0, %v506_v29  ;;  %1078 = vmatmul.mubr.msk.f32.vlgmr.msra.gmra.mxu0 %vm83_vm2, %v506_v29 }
 0xaa6   :  { %1092 = vmatpush3.msra.mxu0 %v1213_v4  ;;  %1099 = vmatprep.mubr.msk.f32.mxu0 %vm1169_vm1, %v1168_v0 }
 0xaa7   :  { %1093 = vmatprep.subr.mxu0 %v1168_v0 }
 0xaa8   :  { %1094 = vmatpush3.msra.mxu0 %v1208_v3 }
 0xaa9   :  { %1095 = vmatprep.subr.mxu0 %v1168_v0 }
 0xaaa   :  { %1096 = vmatpush3.msra.mxu0 %v1203_v2 }
 0xaab   :  { %1097 = vmatprep.subr.mxu0 %v1168_v0 }
 0xaac   :  { %1098 = vmatpush3.msra.mxu0 %v1198_v1 }
 0xb65   :  { %v580_v30 = vpop.f32.mrf.mxu0 }
 0xb66   :  { %v581_v31 = vadd.f32 %v1251_v6, %v580_v30  ;;  %v980_v30 = vld [vmem:[%s1405_s0 + $0xe] sm:$0x3] }
 0xb67   :  { %v1079_v32 = vpop.f32.mrf.mxu0 }
 0xb68   :  { %592 = vrot.lane.b32.xlu1 %v581_v31, %s1170_s21  ;;  %v584_v34 = vadd.f32 %v968_v33, %v581_v31 }
 0xb6a   :  { %v970_v35 = vmul.f32 -1.442695, %v584_v34 }
 0xb6c   :  { %1142 = vpow2.f32 %v970_v35 }
 0xb79   :  { %v1143_v36 = vpop.eup %1142 }
 0xb7a   :  { %v588_v37 = vadd.f32 1.0, %v1143_v36 }
 0xb7c   :  { %1144 = vrcp.f32 %v588_v37 }
 0xb89   :  { %v1145_v38 = vpop.eup %1144 }
 0xb8a   :  { %v602_v44 = vsub.f32 1.0, %v1145_v38  ;;  %v608_v46 = vmul.f32 %v1145_v38, %v503_v28 }
 0xbda   :  { %v593_v39 = vpop.permute.xlu1 %592 }
 0xbdb   :  { %v595_v40 = vmul.f32 %v1145_v38, %v593_v39 }
 0xbdd   :  { %597 = vrot.lane.b32.xlu0 %v595_v40, %s1170_s21 }
 0xc4f   :  { %v598_v41 = vpop.permute.xlu0 %597 }
 0xc50   :  { %v600_v42 = vadd.f32 %v968_v33, %v598_v41 }
 0xc52   :  { %1146 = vtanh.f32 %v600_v42 }
 0xc5f   :  { %v1147_v43 = vpop.eup %1146 }
 0xc60   :  { %604 = vrot.lane.b32.xlu1 %v1147_v43, %s1171_s2 }
 0xcd2   :  { %v605_v45 = vpop.permute.xlu1 %604 }
 0xcd3   :  { %v607_v47 = vmul.f32 %v605_v45, %v602_v44 }
 0xcd5   :  { %v609_v48 = vadd.f32 %v608_v46, %v607_v47 }
 0xcd7   :  { %611 = vrot.lane.b32.xlu0 %v609_v48, %s1171_s2 }
 0xd49   :  { %v612_v49 = vpop.permute.xlu0 %611 }
 0xd4a   :  { %971 = vst.msk [vmem:[%s1408_s3 + $0x8] sm:$0x3] %vm16_vm0, %v612_v49  ;;  %1089 = vmatmul.mubr.msk.f32.vlgmr.msra.gmra.mxu1 %vm83_vm2, %v612_v49 }
 0xd4b   :  { %1103 = vmatpush3.msra.mxu1 %v1213_v4  ;;  %1110 = vmatprep.mubr.msk.f32.mxu1 %vm1169_vm1, %v1168_v0  ;;  %v972_v4 = vld [vmem:[%s1405_s0 + $0xa] sm:$0x3] }
 0xd4c   :  { %1104 = vmatprep.subr.mxu1 %v1168_v0 }
 0xd4d   :  { %1105 = vmatpush3.msra.mxu1 %v1208_v3 }
 0xd4e   :  { %1106 = vmatprep.subr.mxu1 %v1168_v0 }
 0xd4f   :  { %1107 = vmatpush3.msra.mxu1 %v1203_v2 }
 0xd50   :  { %1108 = vmatprep.subr.mxu1 %v1168_v0 }
 0xd51   :  { %1109 = vmatpush3.msra.mxu1 %v1198_v1 }
 0xe0a   :  { %v686_v50 = vpop.f32.mrf.mxu1 }
 0xe0b   :  { %v687_v51 = vadd.f32 %v1251_v6, %v686_v50 }
 0xe0c   :  { %v1090_v52 = vpop.f32.mrf.mxu1 }
 0xe0d   :  { %698 = vrot.lane.b32.xlu1 %v687_v51, %s1170_s21  ;;  %v690_v53 = vadd.f32 %v972_v4, %v687_v51 }
 0xe0f   :  { %v974_v3 = vmul.f32 -1.442695, %v690_v53 }
 0xe11   :  { %1148 = vpow2.f32 %v974_v3 }
 0xe1e   :  { %v1149_v54 = vpop.eup %1148 }
 0xe1f   :  { %v694_v55 = vadd.f32 1.0, %v1149_v54 }
 0xe21   :  { %1150 = vrcp.f32 %v694_v55 }
 0xe2e   :  { %v1151_v2 = vpop.eup %1150 }
 0xe2f   :  { %v708_v59 = vsub.f32 1.0, %v1151_v2  ;;  %v714_v61 = vmul.f32 %v1151_v2, %v609_v48 }
 0xe7f   :  { %v699_v0 = vpop.permute.xlu1 %698 }
 0xe80   :  { %v701_v56 = vmul.f32 %v1151_v2, %v699_v0 }
 0xe82   :  { %703 = vrot.lane.b32.xlu0 %v701_v56, %s1170_s21 }
 0xef4   :  { %v704_v1 = vpop.permute.xlu0 %703 }
 0xef5   :  { %v706_v57 = vadd.f32 %v972_v4, %v704_v1 }
 0xef7   :  { %1152 = vtanh.f32 %v706_v57 }
 0xf04   :  { %v1153_v58 = vpop.eup %1152 }
 0xf05   :  { %710 = vrot.lane.b32.xlu1 %v1153_v58, %s1171_s2 }
 0xf77   :  { %v711_v60 = vpop.permute.xlu1 %710 }
 0xf78   :  { %v713_v62 = vmul.f32 %v711_v60, %v708_v59 }
 0xf7a   :  { %v715_v63 = vadd.f32 %v714_v61, %v713_v62 }
 0xf7c   :  { %717 = vrot.lane.b32.xlu0 %v715_v63, %s1171_s2 }
 0xfee   :  { %v718_v5 = vpop.permute.xlu0 %717 }
 0xfef   :  { %975 = vst.msk [vmem:[%s1408_s3 + $0xa] sm:$0x3] %vm16_vm0, %v718_v5  ;;  %1100 = vmatmul.mubr.msk.f32.vlgmr.msra.gmra.mxu0 %vm83_vm2, %v718_v5 }
0x10af   :  { %v792_v7 = vpop.f32.mrf.mxu0 }
0x10b0   :  { %v793_v8 = vadd.f32 %v1251_v6, %v792_v7 }
0x10b1   :  { %v1101_v9 = vpop.f32.mrf.mxu0 }
0x10b2   :  { %804 = vrot.lane.b32.xlu1 %v793_v8, %s1170_s21  ;;  %v796_v11 = vadd.f32 %v976_v10, %v793_v8 }
0x10b4   :  { %v978_v12 = vmul.f32 -1.442695, %v796_v11 }
0x10b6   :  { %1154 = vpow2.f32 %v978_v12 }
0x10c3   :  { %v1155_v13 = vpop.eup %1154 }
0x10c4   :  { %v800_v14 = vadd.f32 1.0, %v1155_v13 }
0x10c6   :  { %1156 = vrcp.f32 %v800_v14 }
0x10d3   :  { %v1157_v15 = vpop.eup %1156 }
0x10d4   :  { %v814_v21 = vsub.f32 1.0, %v1157_v15  ;;  %v820_v23 = vmul.f32 %v1157_v15, %v715_v63 }
0x1124   :  { %v805_v16 = vpop.permute.xlu1 %804 }
0x1125   :  { %v807_v17 = vmul.f32 %v1157_v15, %v805_v16 }
0x1127   :  { %809 = vrot.lane.b32.xlu0 %v807_v17, %s1170_s21 }
0x1199   :  { %v810_v18 = vpop.permute.xlu0 %809 }
0x119a   :  { %v812_v19 = vadd.f32 %v976_v10, %v810_v18 }
0x119c   :  { %1158 = vtanh.f32 %v812_v19 }
0x11a9   :  { %v1159_v20 = vpop.eup %1158 }
0x11aa   :  { %816 = vrot.lane.b32.xlu1 %v1159_v20, %s1171_s2 }
0x121c   :  { %v817_v22 = vpop.permute.xlu1 %816 }
0x121d   :  { %v819_v24 = vmul.f32 %v817_v22, %v814_v21 }
0x121f   :  { %v821_v25 = vadd.f32 %v820_v23, %v819_v24 }
0x1221   :  { %823 = vrot.lane.b32.xlu0 %v821_v25, %s1171_s2 }
0x1293   :  { %v824_v26 = vpop.permute.xlu0 %823 }
0x1294   :  { %979 = vst.msk [vmem:[%s1408_s3 + $0xc] sm:$0x3] %vm16_vm0, %v824_v26  ;;  %1111 = vmatmul.mubr.msk.f32.vlgmr.msra.gmra.mxu1 %vm83_vm2, %v824_v26 }
0x1354   :  { %v898_v27 = vpop.f32.mrf.mxu1 }
0x1355   :  { %v899_v28 = vadd.f32 %v1251_v6, %v898_v27 }
0x1356   :  { %v1112_v29 = vpop.f32.mrf.mxu1 }
0x1357   :  { %910 = vrot.lane.b32.xlu1 %v899_v28, %s1170_s21  ;;  %v902_v31 = vadd.f32 %v980_v30, %v899_v28 }
0x1359   :  { %v982_v32 = vmul.f32 -1.442695, %v902_v31 }
0x135b   :  { %1160 = vpow2.f32 %v982_v32 }
0x1368   :  { %v1161_v33 = vpop.eup %1160 }
0x1369   :  { %v906_v34 = vadd.f32 1.0, %v1161_v33 }
0x136b   :  { %1162 = vrcp.f32 %v906_v34 }
0x1378   :  { %v1163_v35 = vpop.eup %1162 }
0x1379   :  { %v920_v40 = vsub.f32 1.0, %v1163_v35  ;;  %v926_v42 = vmul.f32 %v1163_v35, %v821_v25 }
0x13c9   :  { %v911_v36 = vpop.permute.xlu1 %910 }
0x13ca   :  { %v913_v37 = vmul.f32 %v1163_v35, %v911_v36 }
0x13cc   :  { %915 = vrot.lane.b32.xlu0 %v913_v37, %s1170_s21 }
0x143e   :  { %v916_v38 = vpop.permute.xlu0 %915 }
0x143f   :  { %v918_v6 = vadd.f32 %v980_v30, %v916_v38 }
0x1441   :  { %1164 = vtanh.f32 %v918_v6 }
0x144e   :  { %v1165_v39 = vpop.eup %1164 }
0x144f   :  { %922 = vrot.lane.b32.xlu1 %v1165_v39, %s1171_s2 }
0x14c1   :  { %v923_v41 = vpop.permute.xlu1 %922 }
0x14c2   :  { %v925_v43 = vmul.f32 %v923_v41, %v920_v40 }
0x14c4   :  { %v927_v44 = vadd.f32 %v926_v42, %v925_v43 }
0x14c6   :  { %929 = vrot.lane.b32.xlu0 %v927_v44, %s1171_s2 }
0x1538   :  { %v930_v45 = vpop.permute.xlu0 %929 }
0x1539   :  { %983 = vst.msk [vmem:[%s1408_s3 + $0xe] sm:$0x3] %vm16_vm0, %v930_v45  ;;  %934 = vst.msk [vmem:[#allocation2] sm:$0x3] %vm16_vm0, %v930_v45 }
0x153a   :  { %939 = vsyncmov [#allocation4] }
0x153d   :  { %s940_s21 = vpop.sfrf %939 }
0x153e   :  { %p984_p0 = scmp.ne.s32.totalorder %s940_s21, 0 }
0x1540   :  { %944 = shalt.err (%p984_p0)  }

// kernel: nsp_gru_forward.33
= control target key start
LH: loop header
LB: loop body
LE: loop exit
PB: predicated region body
PF: predicated region fallthrough
CT: control target
= control target key end

     0   :  { %vm24_vm0 = vcmask 517120   ;;  %vm31_vm1 = vcmask 1024   ;;  %s70_s0 = inlined_call_operand.vmem [shape: f32[2,64], index: 0, kind: input, shape index: {}]   ;;  %s71_s1 = inlined_call_operand.vmem [shape: f32[1,64], index: 1, kind: input, shape index: {}]   ;;  %s72_s2 = inlined_call_operand.<no memory space> [shape: f32[1,1], index: 2, kind: input, shape index: {}]   ;;  %s73_s3 = inlined_call_operand.vmem [shape: f32[2,1], index: 3, kind: output, shape index: {}]  }
   0x1   :  { %v15_v0 = vld [vmem:[%s70_s0] sm:$0x3]  ;;  %v29_v4 = vstv %s72_s2 }
   0x2   :  { %v37_v1 = vld [vmem:[%s71_s1] ss:$0 sm:$0xff] }
   0x3   :  { %v23_v2 = vmul.f32 %v37_v1, %v15_v0 }
   0x5   :  { %v25_v3 = vsel %vm24_vm0, %v23_v2, 0.0 }
   0x6   :  { %26 = vadd.xlane.f32.xlu0 %v25_v3 }
  0x8f   :  { %v27_v5 = vpop.xlane.xlu0 %26 }
  0x90   :  { %v30_v6 = vadd.f32 %v29_v4, %v27_v5 }
  0x92   :  { %32 = vst.msk [vmem:[%s73_s3] sm:$0x3] %vm31_vm1, %v30_v6 }

</bundles_post_ra>
